<compile_context>
chip_gen: v7x
topology: tpu7x:2x2x1
jax: 0.10.0
libtpu: 0.0.40
codegen_flags: <defaults>
</compile_context>

<pallas_src>
import functools

import jax
import jax.numpy as jnp
from jax.experimental import pallas as pl
from jax.experimental.pallas import tpu as pltpu


def _round_up(x, m):
    return ((x + m - 1) // m) * m


def readnet_kernel(x_ref, w1_ref, b1_ref, w2_ref, b2_ref, w3_ref, b3_ref, o_ref):
    # x_ref: (TB, H*R) bf16. The reduction over R is already folded into w1
    # (row-replicated), so layer 1 is a single lane-dense MXU matmul.
    h1 = jnp.dot(x_ref[...], w1_ref[...],
                 preferred_element_type=jnp.float32) + b1_ref[...]
    h1 = jnp.where(h1 > 0, h1, 0.2 * h1)            # LeakyReLU(0.2), f32 on VPU

    h2 = jnp.dot(h1.astype(jnp.bfloat16), w2_ref[...],
                 preferred_element_type=jnp.float32) + b2_ref[...]
    h2 = jnp.where(h2 > 0, h2, 0.2 * h2)            # LeakyReLU(0.2), f32 on VPU

    h3 = jnp.dot(h2.astype(jnp.bfloat16), w3_ref[...],
                 preferred_element_type=jnp.float32) + b3_ref[...]
    o_ref[...] = jnp.tanh(h3).astype(o_ref.dtype)   # tanh on EUP, f32


@functools.partial(jax.jit, static_argnames=("tb",))
def readnet_forward(x, params, *, tb=256):
    """x: (B, hsize, resolution) float32. Returns (B, hsize) float32."""
    w1, b1, w2, b2, w3, b3 = params                 # (in, out) layout, f32
    B, H, R = x.shape
    K = H * R                                       # folded contraction dim
    HP = _round_up(H, 128)                          # lane-dense output width
    Bp = _round_up(max(B, 1), tb)                   # padded batch (grid over B)

    # Fold sum over R into the first matmul: W1_rep[h*R + r, :] = W1[h, :].
    w1_rep = jnp.repeat(w1, R, axis=0).astype(jnp.bfloat16)          # (K, 256)
    w2_b = w2.astype(jnp.bfloat16)                                   # (256, 512)
    # Zero-pad the last layer to a 128-multiple output width.
    w3_pad = jnp.zeros((w3.shape[0], HP), jnp.float32).at[:, :H].set(w3)
    w3_pad = w3_pad.astype(jnp.bfloat16)                             # (512, HP)
    b3_pad = jnp.zeros((1, HP), jnp.float32).at[:, :H].set(b3)

    # Lane-dense, bf16 input stream; pad batch to a multiple of the tile.
    x_flat = x.reshape(B, K).astype(jnp.bfloat16)
    x_pad = jnp.zeros((Bp, K), jnp.bfloat16).at[:B].set(x_flat)

    grid = (Bp // tb,)
    resident = lambda shape: pl.BlockSpec(shape, lambda i: (0, 0))

    cost = pl.CostEstimate(
        flops=2 * Bp * (K * 256 + 256 * 512 + 512 * HP),
        transcendentals=Bp * HP,
        bytes_accessed=(x_pad.size * 2
                        + (w1_rep.size + w2_b.size + w3_pad.size) * 2
                        + (b1.size + b2.size + b3_pad.size) * 4
                        + Bp * HP * 4),
    )

    out_full = pl.pallas_call(
        readnet_kernel,
        out_shape=jax.ShapeDtypeStruct((Bp, HP), jnp.float32),
        grid=grid,
        in_specs=[
            pl.BlockSpec((tb, K), lambda i: (i, 0)),   # streamed x tile
            resident(w1_rep.shape),
            resident(b1.shape),
            resident(w2_b.shape),
            resident(b2.shape),
            resident(w3_pad.shape),
            resident(b3_pad.shape),
        ],
        out_specs=pl.BlockSpec((tb, HP), lambda i: (i, 0)),
        compiler_params=pltpu.CompilerParams(
            dimension_semantics=("parallel",)),
        cost_estimate=cost,
    )(x_pad, w1_rep, b1, w2_b, b2, w3_pad, b3_pad)

    return out_full[:B, :H]


def init_params(key, hsize):
    """Deterministic synthetic init matching the Linear layer shapes."""
    k1, k2, k3, k4, k5, k6 = jax.random.split(key, 6)

    def lin(kw, kb, fan_in, fan_out):
        bound = 1.0 / jnp.sqrt(fan_in)
        w = jax.random.uniform(kw, (fan_in, fan_out), jnp.float32, -bound, bound)
        b = jax.random.uniform(kb, (1, fan_out), jnp.float32, -bound, bound)
        return w, b

    w1, b1 = lin(k1, k2, hsize, 256)
    w2, b2 = lin(k3, k4, 256, 512)
    w3, b3 = lin(k5, k6, 512, hsize)
    return (w1, b1, w2, b2, w3, b3)


def readnet_reference(x, params):
    """Plain-JAX f32 reference (matches the PyTorch module semantics)."""
    w1, b1, w2, b2, w3, b3 = params
    h = jnp.sum(x, axis=-1)
    h = h @ w1 + b1
    h = jnp.where(h > 0, h, 0.2 * h)
    h = h @ w2 + b2
    h = jnp.where(h > 0, h, 0.2 * h)
    h = h @ w3 + b3
    return jnp.tanh(h)


if __name__ == "__main__":
    B, hsize, resolution = 2, 32, 8

    key = jax.random.PRNGKey(0)
    kx, kp = jax.random.split(key)
    x = jax.random.normal(kx, (B, hsize, resolution), dtype=jnp.float32)
    params = init_params(kp, hsize)

    out = readnet_forward(x, params)
    out = jax.block_until_ready(out)

    ref = readnet_reference(x, params)
    assert out.shape == (B, hsize), out.shape
    # bf16 MXU weights -> looser tolerance than a pure-f32 path (~1e-2 rel).
    assert jnp.allclose(out, ref, atol=5e-2, rtol=5e-2), "mismatch vs reference"

    print("KERNEL_OK")
</pallas_src>

<mosaic_0001>
module attributes {stable_mosaic.version = 11 : i64} {
  func.func @readnet_kernel(%arg0: i32, %arg1: memref<256x256xbf16, #tpu.memory_space<vmem>>, %arg2: memref<256x256xbf16, #tpu.memory_space<vmem>>, %arg3: memref<1x256xf32, #tpu.memory_space<vmem>>, %arg4: memref<256x512xbf16, #tpu.memory_space<vmem>>, %arg5: memref<1x512xf32, #tpu.memory_space<vmem>>, %arg6: memref<512x128xbf16, #tpu.memory_space<vmem>>, %arg7: memref<1x128xf32, #tpu.memory_space<vmem>>, %arg8: memref<256x128xf32, #tpu.memory_space<vmem>>) attributes {dimension_semantics = [#tpu.dimension_semantics<parallel>], iteration_bounds = array<i64: 1>, scalar_prefetch = 0 : i64, scratch_operands = 0 : i64, tpu.core_type = #tpu.core_type<tc>, window_params = [{transform_indices = @transform_0, window_bounds = array<i64: 256, 256>}, {pipeline_mode = #tpu.pipeline_mode<synchronous>, transform_indices = @transform_1, window_bounds = array<i64: 256, 256>}, {pipeline_mode = #tpu.pipeline_mode<synchronous>, transform_indices = @transform_2, window_bounds = array<i64: 1, 256>}, {pipeline_mode = #tpu.pipeline_mode<synchronous>, transform_indices = @transform_3, window_bounds = array<i64: 256, 512>}, {pipeline_mode = #tpu.pipeline_mode<synchronous>, transform_indices = @transform_4, window_bounds = array<i64: 1, 512>}, {pipeline_mode = #tpu.pipeline_mode<synchronous>, transform_indices = @transform_5, window_bounds = array<i64: 512, 128>}, {pipeline_mode = #tpu.pipeline_mode<synchronous>, transform_indices = @transform_6, window_bounds = array<i64: 1, 128>}, {transform_indices = @transform_7, window_bounds = array<i64: 256, 128>}]} {
    %c0 = arith.constant 0 : index
    %c0_0 = arith.constant 0 : index
    %0 = vector.load %arg1[%c0, %c0_0] : memref<256x256xbf16, #tpu.memory_space<vmem>>, vector<256x256xbf16>
    %c0_1 = arith.constant 0 : index
    %c0_2 = arith.constant 0 : index
    %1 = vector.load %arg2[%c0_1, %c0_2] : memref<256x256xbf16, #tpu.memory_space<vmem>>, vector<256x256xbf16>
    %cst = arith.constant dense<0.000000e+00> : vector<256x256xf32>
    %2 = tpu.matmul %0, %1, %cst {dimension_numbers = #tpu.dot_dimension_numbers<[1], [0], [0], [1], [0, 0, 1, 1], [], []>} : vector<256x256xbf16>, vector<256x256xbf16>, vector<256x256xf32> -> vector<256x256xf32>
    %c0_3 = arith.constant 0 : index
    %c0_4 = arith.constant 0 : index
    %3 = vector.load %arg3[%c0_3, %c0_4] : memref<1x256xf32, #tpu.memory_space<vmem>>, vector<1x256xf32>
    %4 = vector.broadcast %3 : vector<1x256xf32> to vector<256x256xf32>
    %5 = arith.addf %2, %4 : vector<256x256xf32>
    %cst_5 = arith.constant 0.000000e+00 : f32
    %6 = vector.broadcast %cst_5 : f32 to vector<256x256xf32>
    %7 = arith.cmpf ogt, %5, %6 : vector<256x256xf32>
    %cst_6 = arith.constant 2.000000e-01 : f32
    %8 = vector.broadcast %cst_6 : f32 to vector<256x256xf32>
    %9 = arith.mulf %8, %5 : vector<256x256xf32>
    %10 = arith.select %7, %5, %9 : vector<256x256xi1>, vector<256x256xf32>
    %11 = arith.truncf %10 : vector<256x256xf32> to vector<256x256xbf16>
    %c0_7 = arith.constant 0 : index
    %c0_8 = arith.constant 0 : index
    %12 = vector.load %arg4[%c0_7, %c0_8] : memref<256x512xbf16, #tpu.memory_space<vmem>>, vector<256x512xbf16>
    %cst_9 = arith.constant dense<0.000000e+00> : vector<256x512xf32>
    %13 = tpu.matmul %11, %12, %cst_9 {dimension_numbers = #tpu.dot_dimension_numbers<[1], [0], [0], [1], [0, 0, 1, 1], [], []>} : vector<256x256xbf16>, vector<256x512xbf16>, vector<256x512xf32> -> vector<256x512xf32>
    %c0_10 = arith.constant 0 : index
    %c0_11 = arith.constant 0 : index
    %14 = vector.load %arg5[%c0_10, %c0_11] : memref<1x512xf32, #tpu.memory_space<vmem>>, vector<1x512xf32>
    %15 = vector.broadcast %14 : vector<1x512xf32> to vector<256x512xf32>
    %16 = arith.addf %13, %15 : vector<256x512xf32>
    %cst_12 = arith.constant 0.000000e+00 : f32
    %17 = vector.broadcast %cst_12 : f32 to vector<256x512xf32>
    %18 = arith.cmpf ogt, %16, %17 : vector<256x512xf32>
    %cst_13 = arith.constant 2.000000e-01 : f32
    %19 = vector.broadcast %cst_13 : f32 to vector<256x512xf32>
    %20 = arith.mulf %19, %16 : vector<256x512xf32>
    %21 = arith.select %18, %16, %20 : vector<256x512xi1>, vector<256x512xf32>
    %22 = arith.truncf %21 : vector<256x512xf32> to vector<256x512xbf16>
    %c0_14 = arith.constant 0 : index
    %c0_15 = arith.constant 0 : index
    %23 = vector.load %arg6[%c0_14, %c0_15] : memref<512x128xbf16, #tpu.memory_space<vmem>>, vector<512x128xbf16>
    %cst_16 = arith.constant dense<0.000000e+00> : vector<256x128xf32>
    %24 = tpu.matmul %22, %23, %cst_16 {dimension_numbers = #tpu.dot_dimension_numbers<[1], [0], [0], [1], [0, 0, 1, 1], [], []>} : vector<256x512xbf16>, vector<512x128xbf16>, vector<256x128xf32> -> vector<256x128xf32>
    %c0_17 = arith.constant 0 : index
    %c0_18 = arith.constant 0 : index
    %25 = vector.load %arg7[%c0_17, %c0_18] : memref<1x128xf32, #tpu.memory_space<vmem>>, vector<1x128xf32>
    %26 = vector.broadcast %25 : vector<1x128xf32> to vector<256x128xf32>
    %27 = arith.addf %24, %26 : vector<256x128xf32>
    %28 = math.tanh %27 : vector<256x128xf32>
    %c0_19 = arith.constant 0 : index
    %c0_20 = arith.constant 0 : index
    %29 = vector.load %arg8[%c0_19, %c0_20] : memref<256x128xf32, #tpu.memory_space<vmem>>, vector<256x128xf32>
    tpu.vector_store %arg8[%c0_19, %c0_20], %28 {strides = array<i32>} : memref<256x128xf32, #tpu.memory_space<vmem>>, vector<256x128xf32>,
    return
  }
  func.func @transform_0(%arg0: i32) -> (i32, i32) {
    %c0_i32 = arith.constant 0 : i32
    %c0_i32_0 = arith.constant 0 : i32
    return %arg0, %c0_i32 : i32, i32
  }
  func.func @transform_1(%arg0: i32) -> (i32, i32) {
    %c0_i32 = arith.constant 0 : i32
    %c0_i32_0 = arith.constant 0 : i32
    %c0_i32_1 = arith.constant 0 : i32
    return %c0_i32, %c0_i32_0 : i32, i32
  }
  func.func @transform_2(%arg0: i32) -> (i32, i32) {
    %c0_i32 = arith.constant 0 : i32
    %c0_i32_0 = arith.constant 0 : i32
    %c0_i32_1 = arith.constant 0 : i32
    return %c0_i32, %c0_i32_0 : i32, i32
  }
  func.func @transform_3(%arg0: i32) -> (i32, i32) {
    %c0_i32 = arith.constant 0 : i32
    %c0_i32_0 = arith.constant 0 : i32
    %c0_i32_1 = arith.constant 0 : i32
    return %c0_i32, %c0_i32_0 : i32, i32
  }
  func.func @transform_4(%arg0: i32) -> (i32, i32) {
    %c0_i32 = arith.constant 0 : i32
    %c0_i32_0 = arith.constant 0 : i32
    %c0_i32_1 = arith.constant 0 : i32
    return %c0_i32, %c0_i32_0 : i32, i32
  }
  func.func @transform_5(%arg0: i32) -> (i32, i32) {
    %c0_i32 = arith.constant 0 : i32
    %c0_i32_0 = arith.constant 0 : i32
    %c0_i32_1 = arith.constant 0 : i32
    return %c0_i32, %c0_i32_0 : i32, i32
  }
  func.func @transform_6(%arg0: i32) -> (i32, i32) {
    %c0_i32 = arith.constant 0 : i32
    %c0_i32_0 = arith.constant 0 : i32
    %c0_i32_1 = arith.constant 0 : i32
    return %c0_i32, %c0_i32_0 : i32, i32
  }
  func.func @transform_7(%arg0: i32) -> (i32, i32) {
    %c0_i32 = arith.constant 0 : i32
    %c0_i32_0 = arith.constant 0 : i32
    return %arg0, %c0_i32 : i32, i32
  }
}

</mosaic_0001>

<bundles_post_ra>
// kernel: readnet_forward.1
= control target key start
LH: loop header
LB: loop body
LE: loop exit
PB: predicated region body
PF: predicated region fallthrough
CT: control target
= control target key end

     0   :  { %s5166_s1 = inlined_call_operand.vmem [shape: bf16[256,256], index: 1, kind: input, shape index: {}]   ;;  %s5167_s0 = inlined_call_operand.vmem [shape: bf16[256,256], index: 0, kind: input, shape index: {}]   ;;  %s5168_s3 = inlined_call_operand.vmem [shape: bf16[256,512], index: 3, kind: input, shape index: {}]   ;;  %s5169_s5 = inlined_call_operand.vmem [shape: bf16[512,128], index: 5, kind: input, shape index: {}]   ;;  %s5170_s2 = inlined_call_operand.vmem [shape: f32[1,256], index: 2, kind: input, shape index: {}]   ;;  %s5171_s4 = inlined_call_operand.vmem [shape: f32[1,512], index: 4, kind: input, shape index: {}]   ;;  %s5172_s6 = inlined_call_operand.vmem [shape: f32[1,128], index: 6, kind: input, shape index: {}]   ;;  %s5173_s7 = inlined_call_operand.vmem [shape: f32[256,128], index: 7, kind: output, shape index: {}]  }
   0x1   :  { %v3150_v0 = vld [vmem:[%s5166_s1 + $0x4] ss:$8 sps:$4 sm:$0xff]   ;;  %v3152_v1 = vld [vmem:[%s5166_s1] ss:$8 sps:$4 sm:$0xff]   ;;  %v3153_v2 = vld [vmem:[%s5166_s1 + $0x14] ss:$8 sps:$4 sm:$0xff]  }
   0x2   :  { %423 = vmatprep.subr.bf16.mxu0 %v3150_v0  ;;  %3118 = vmatprep.subr.bf16.mxu1 %v3150_v0  ;;  %v3155_v3 = vld [vmem:[%s5166_s1 + $0x10] ss:$8 sps:$4 sm:$0xff]   ;;  %v3156_v4 = vld [vmem:[%s5166_s1 + $0x24] ss:$8 sps:$4 sm:$0xff]   ;;  %v3158_v5 = vld [vmem:[%s5166_s1 + $0x20] ss:$8 sps:$4 sm:$0xff]  }
   0x3   :  { %424 = vmatpush1.bf16.msra.mxu0 %v3152_v1  ;;  %3134 = vmatpush1.bf16.msra.mxu1 %v3152_v1  ;;  %v3159_v6 = vld [vmem:[%s5166_s1 + $0x34] ss:$8 sps:$4 sm:$0xff]   ;;  %v3161_v7 = vld [vmem:[%s5166_s1 + $0x30] ss:$8 sps:$4 sm:$0xff]   ;;  %v3162_v8 = vld [vmem:[%s5166_s1 + $0x44] ss:$8 sps:$4 sm:$0xff]  }
   0x4   :  { %425 = vmatprep.subr.bf16.mxu0 %v3153_v2  ;;  %3119 = vmatprep.subr.bf16.mxu1 %v3153_v2  ;;  %v3164_v9 = vld [vmem:[%s5166_s1 + $0x40] ss:$8 sps:$4 sm:$0xff]   ;;  %v3165_v10 = vld [vmem:[%s5166_s1 + $0x54] ss:$8 sps:$4 sm:$0xff]   ;;  %v3167_v11 = vld [vmem:[%s5166_s1 + $0x50] ss:$8 sps:$4 sm:$0xff]  }
   0x5   :  { %v3168_v12 = vld [vmem:[%s5166_s1 + $0x64] ss:$8 sps:$4 sm:$0xff]   ;;  %v3170_v14 = vld [vmem:[%s5166_s1 + $0x60] ss:$8 sps:$4 sm:$0xff]   ;;  %v3171_v15 = vld [vmem:[%s5166_s1 + $0x74] ss:$8 sps:$4 sm:$0xff]  }
   0x6   :  { %v3200_v13 = vld [vmem:[%s5167_s0 + $0x4] ss:$8 sps:$4 sm:$0xff]   ;;  %v3173_v16 = vld [vmem:[%s5166_s1 + $0x70] ss:$8 sps:$4 sm:$0xff]   ;;  %v3176_v18 = vld [vmem:[%s5166_s1 + $0x80] ss:$8 sps:$4 sm:$0xff]  }
   0x7   :  { %426 = vmatpush1.bf16.msra.mxu0 %v3155_v3  ;;  %3135 = vmatpush1.bf16.msra.mxu1 %v3155_v3  ;;  %v3174_v17 = vld [vmem:[%s5166_s1 + $0x84] ss:$8 sps:$4 sm:$0xff]   ;;  %v3177_v19 = vld [vmem:[%s5166_s1 + $0x94] ss:$8 sps:$4 sm:$0xff]   ;;  %v3179_v21 = vld [vmem:[%s5166_s1 + $0x90] ss:$8 sps:$4 sm:$0xff]  }
   0x8   :  { %427 = vmatprep.subr.bf16.mxu0 %v3156_v4  ;;  %3120 = vmatprep.subr.bf16.mxu1 %v3156_v4  ;;  %v3224_v20 = vld [vmem:[%s5167_s0 + $0x84] ss:$8 sps:$4 sm:$0xff]   ;;  %v3182_v23 = vld [vmem:[%s5166_s1 + $0xa0] ss:$8 sps:$4 sm:$0xff]   ;;  %v3183_v24 = vld [vmem:[%s5166_s1 + $0xb4] ss:$8 sps:$4 sm:$0xff]  }
   0x9   :  { %455 = vmatprep.mubr.bf16.mxu0 %v3200_v13  ;;  %v3180_v22 = vld [vmem:[%s5166_s1 + $0xa4] ss:$8 sps:$4 sm:$0xff]   ;;  %535 = vmatprep.mubr.bf16.mxu1 %v3224_v20  ;;  %v3185_v25 = vld [vmem:[%s5166_s1 + $0xb0] ss:$8 sps:$4 sm:$0xff]   ;;  %v3188_v27 = vld [vmem:[%s5166_s1 + $0xc0] ss:$8 sps:$4 sm:$0xff]  }
   0xa   :  { %v3186_v26 = vld [vmem:[%s5166_s1 + $0xc4] ss:$8 sps:$4 sm:$0xff]   ;;  %v3189_v28 = vld [vmem:[%s5166_s1 + $0xd4] ss:$8 sps:$4 sm:$0xff]   ;;  %v3191_v29 = vld [vmem:[%s5166_s1 + $0xd0] ss:$8 sps:$4 sm:$0xff]  }
   0xb   :  { %428 = vmatpush1.bf16.msra.mxu0 %v3158_v5  ;;  %3136 = vmatpush1.bf16.msra.mxu1 %v3158_v5  ;;  %v3192_v30 = vld [vmem:[%s5166_s1 + $0xe4] ss:$8 sps:$4 sm:$0xff]   ;;  %v3194_v31 = vld [vmem:[%s5166_s1 + $0xe0] ss:$8 sps:$4 sm:$0xff]   ;;  %v3195_v32 = vld [vmem:[%s5166_s1 + $0xf4] ss:$8 sps:$4 sm:$0xff]  }
   0xc   :  { %429 = vmatprep.subr.bf16.mxu0 %v3159_v6  ;;  %3121 = vmatprep.subr.bf16.mxu1 %v3159_v6  ;;  %v3197_v33 = vld [vmem:[%s5166_s1 + $0xf0] ss:$8 sps:$4 sm:$0xff]   ;;  %v3248_v34 = vld [vmem:[%s5168_s3 + $0x4] ss:$16 sps:$4 sm:$0xff]   ;;  %v3198_v35 = vld [vmem:[%s5167_s0] ss:$8 sps:$4 sm:$0xff]  }
   0xd   :  { %v3251_v36 = vld [vmem:[%s5168_s3 + $0xc] ss:$16 sps:$4 sm:$0xff]   ;;  %v3222_v38 = vld [vmem:[%s5167_s0 + $0x80] ss:$8 sps:$4 sm:$0xff]   ;;  %v3254_v42 = vld [vmem:[%s5168_s3 + $0x24] ss:$16 sps:$4 sm:$0xff]  }
   0xe   :  { %v3201_v37 = vld [vmem:[%s5167_s0 + $0x14] ss:$8 sps:$4 sm:$0xff]   ;;  %v3246_v40 = vld [vmem:[%s5168_s3] ss:$16 sps:$4 sm:$0xff]   ;;  %v3249_v41 = vld [vmem:[%s5168_s3 + $0x8] ss:$16 sps:$4 sm:$0xff]  }
   0xf   :  { %430 = vmatpush1.bf16.msra.mxu0 %v3161_v7  ;;  %3137 = vmatpush1.bf16.msra.mxu1 %v3161_v7  ;;  %v3225_v39 = vld [vmem:[%s5167_s0 + $0x94] ss:$8 sps:$4 sm:$0xff]   ;;  %v3252_v44 = vld [vmem:[%s5168_s3 + $0x20] ss:$16 sps:$4 sm:$0xff]   ;;  %v3255_v45 = vld [vmem:[%s5168_s3 + $0x28] ss:$16 sps:$4 sm:$0xff]  }
  0x10   :  { %431 = vmatprep.subr.bf16.mxu0 %v3162_v8  ;;  %3122 = vmatprep.subr.bf16.mxu1 %v3162_v8  ;;  %v3257_v43 = vld [vmem:[%s5168_s3 + $0x2c] ss:$16 sps:$4 sm:$0xff]   ;;  %v3203_v46 = vld [vmem:[%s5167_s0 + $0x10] ss:$8 sps:$4 sm:$0xff]   ;;  %v3260_v47 = vld [vmem:[%s5168_s3 + $0x44] ss:$16 sps:$4 sm:$0xff]  }
  0x11   :  { %v3204_v48 = vld [vmem:[%s5167_s0 + $0x24] ss:$8 sps:$4 sm:$0xff]   ;;  %v3227_v50 = vld [vmem:[%s5167_s0 + $0x90] ss:$8 sps:$4 sm:$0xff]   ;;  %v3206_v58 = vld [vmem:[%s5167_s0 + $0x20] ss:$8 sps:$4 sm:$0xff]  }
  0x12   :  { %v3263_v49 = vld [vmem:[%s5168_s3 + $0x4c] ss:$16 sps:$4 sm:$0xff]   ;;  %v3258_v52 = vld [vmem:[%s5168_s3 + $0x40] ss:$16 sps:$4 sm:$0xff]   ;;  %v3261_v53 = vld [vmem:[%s5168_s3 + $0x48] ss:$16 sps:$4 sm:$0xff]  }
  0x13   :  { %432 = vmatpush1.bf16.msra.mxu0 %v3164_v9  ;;  %3138 = vmatpush1.bf16.msra.mxu1 %v3164_v9  ;;  %v3228_v51 = vld [vmem:[%s5167_s0 + $0xa4] ss:$8 sps:$4 sm:$0xff]   ;;  %v3264_v56 = vld [vmem:[%s5168_s3 + $0x60] ss:$16 sps:$4 sm:$0xff]   ;;  %v3267_v57 = vld [vmem:[%s5168_s3 + $0x68] ss:$16 sps:$4 sm:$0xff]  }
  0x14   :  { %433 = vmatprep.subr.bf16.mxu0 %v3165_v10  ;;  %3123 = vmatprep.subr.bf16.mxu1 %v3165_v10  ;;  %v3266_v54 = vld [vmem:[%s5168_s3 + $0x64] ss:$16 sps:$4 sm:$0xff]   ;;  %v3269_v55 = vld [vmem:[%s5168_s3 + $0x6c] ss:$16 sps:$4 sm:$0xff]   ;;  %v3230_v59 = vld [vmem:[%s5167_s0 + $0xa0] ss:$8 sps:$4 sm:$0xff]  }
  0x15   :  { %v3272_v60 = vld [vmem:[%s5168_s3 + $0x84] ss:$16 sps:$4 sm:$0xff]   ;;  %v3275_v62 = vld [vmem:[%s5168_s3 + $0x8c] ss:$16 sps:$4 sm:$0xff]   ;;  %v3270_v0 = vld [vmem:[%s5168_s3 + $0x80] ss:$16 sps:$4 sm:$0xff]  }
  0x16   :  { %v3207_v61 = vld [vmem:[%s5167_s0 + $0x34] ss:$8 sps:$4 sm:$0xff]   ;;  %v3273_v1 = vld [vmem:[%s5168_s3 + $0x88] ss:$16 sps:$4 sm:$0xff]   ;;  %v3276_v4 = vld [vmem:[%s5168_s3 + $0xa0] ss:$16 sps:$4 sm:$0xff]  }
  0x17   :  { %434 = vmatpush1.bf16.msra.mxu0 %v3167_v11  ;;  %3139 = vmatpush1.bf16.msra.mxu1 %v3167_v11  ;;  %v3231_v63 = vld [vmem:[%s5167_s0 + $0xb4] ss:$8 sps:$4 sm:$0xff]   ;;  %v3279_v5 = vld [vmem:[%s5168_s3 + $0xa8] ss:$16 sps:$4 sm:$0xff]   ;;  %v3210_v10 = vld [vmem:[%s5167_s0 + $0x44] ss:$8 sps:$4 sm:$0xff]  }
  0x18   :  { %435 = vmatprep.subr.bf16.mxu0 %v3168_v12  ;;  %3124 = vmatprep.subr.bf16.mxu1 %v3168_v12  ;;  %v3278_v2 = vld [vmem:[%s5168_s3 + $0xa4] ss:$16 sps:$4 sm:$0xff]   ;;  %v3281_v3 = vld [vmem:[%s5168_s3 + $0xac] ss:$16 sps:$4 sm:$0xff]   ;;  %v3209_v8 = vld [vmem:[%s5167_s0 + $0x30] ss:$8 sps:$4 sm:$0xff]  }
  0x19   :  { %v3284_v6 = vld [vmem:[%s5168_s3 + $0xc4] ss:$16 sps:$4 sm:$0xff]   ;;  %v3287_v7 = vld [vmem:[%s5168_s3 + $0xcc] ss:$16 sps:$4 sm:$0xff]   ;;  %v3233_v9 = vld [vmem:[%s5167_s0 + $0xb0] ss:$8 sps:$4 sm:$0xff]  }
  0x1a   :  { %v3234_v11 = vld [vmem:[%s5167_s0 + $0xc4] ss:$8 sps:$4 sm:$0xff]   ;;  %v3282_v12 = vld [vmem:[%s5168_s3 + $0xc0] ss:$16 sps:$4 sm:$0xff]   ;;  %v3285_v13 = vld [vmem:[%s5168_s3 + $0xc8] ss:$16 sps:$4 sm:$0xff]  }
  0x1b   :  { %436 = vmatpush1.bf16.msra.mxu0 %v3170_v14  ;;  %3140 = vmatpush1.bf16.msra.mxu1 %v3170_v14  ;;  %v3290_v14 = vld [vmem:[%s5168_s3 + $0xe4] ss:$16 sps:$4 sm:$0xff]   ;;  %v3212_v20 = vld [vmem:[%s5167_s0 + $0x40] ss:$8 sps:$4 sm:$0xff]  }
  0x1c   :  { %437 = vmatprep.subr.bf16.mxu0 %v3171_v15  ;;  %3125 = vmatprep.subr.bf16.mxu1 %v3171_v15  ;;  %v3293_v15 = vld [vmem:[%s5168_s3 + $0xec] ss:$16 sps:$4 sm:$0xff]  }
  0x1f   :  { %438 = vmatpush1.bf16.msra.mxu0 %v3173_v16  ;;  %3141 = vmatpush1.bf16.msra.mxu1 %v3173_v16  ;;  %v3288_v16 = vld [vmem:[%s5168_s3 + $0xe0] ss:$16 sps:$4 sm:$0xff]  }
  0x20   :  { %439 = vmatprep.subr.bf16.mxu0 %v3174_v17  ;;  %3126 = vmatprep.subr.bf16.mxu1 %v3174_v17  ;;  %v3291_v17 = vld [vmem:[%s5168_s3 + $0xe8] ss:$16 sps:$4 sm:$0xff]  }
  0x23   :  { %440 = vmatpush1.bf16.msra.mxu0 %v3176_v18  ;;  %3142 = vmatpush1.bf16.msra.mxu1 %v3176_v18  ;;  %v3296_v18 = vld [vmem:[%s5168_s3 + $0x104] ss:$16 sps:$4 sm:$0xff]  }
  0x24   :  { %441 = vmatprep.subr.bf16.mxu0 %v3177_v19  ;;  %3127 = vmatprep.subr.bf16.mxu1 %v3177_v19  ;;  %v3299_v19 = vld [vmem:[%s5168_s3 + $0x10c] ss:$16 sps:$4 sm:$0xff]  }
  0x27   :  { %442 = vmatpush1.bf16.msra.mxu0 %v3179_v21  ;;  %3143 = vmatpush1.bf16.msra.mxu1 %v3179_v21  ;;  %v3236_v21 = vld [vmem:[%s5167_s0 + $0xc0] ss:$8 sps:$4 sm:$0xff]  }
  0x28   :  { %443 = vmatprep.subr.bf16.mxu0 %v3180_v22  ;;  %3128 = vmatprep.subr.bf16.mxu1 %v3180_v22  ;;  %v3213_v22 = vld [vmem:[%s5167_s0 + $0x54] ss:$8 sps:$4 sm:$0xff]  }
  0x2b   :  { %444 = vmatpush1.bf16.msra.mxu0 %v3182_v23  ;;  %3144 = vmatpush1.bf16.msra.mxu1 %v3182_v23  ;;  %v3237_v23 = vld [vmem:[%s5167_s0 + $0xd4] ss:$8 sps:$4 sm:$0xff]  }
  0x2c   :  { %445 = vmatprep.subr.bf16.mxu0 %v3183_v24  ;;  %3129 = vmatprep.subr.bf16.mxu1 %v3183_v24  ;;  %v3294_v24 = vld [vmem:[%s5168_s3 + $0x100] ss:$16 sps:$4 sm:$0xff]  }
  0x2f   :  { %446 = vmatpush1.bf16.msra.mxu0 %v3185_v25  ;;  %3145 = vmatpush1.bf16.msra.mxu1 %v3185_v25  ;;  %v3297_v25 = vld [vmem:[%s5168_s3 + $0x108] ss:$16 sps:$4 sm:$0xff]  }
  0x30   :  { %447 = vmatprep.subr.bf16.mxu0 %v3186_v26  ;;  %3130 = vmatprep.subr.bf16.mxu1 %v3186_v26  ;;  %v3302_v26 = vld [vmem:[%s5168_s3 + $0x124] ss:$16 sps:$4 sm:$0xff]  }
  0x33   :  { %448 = vmatpush1.bf16.msra.mxu0 %v3188_v27  ;;  %3146 = vmatpush1.bf16.msra.mxu1 %v3188_v27  ;;  %v3305_v27 = vld [vmem:[%s5168_s3 + $0x12c] ss:$16 sps:$4 sm:$0xff]  }
  0x34   :  { %449 = vmatprep.subr.bf16.mxu0 %v3189_v28  ;;  %3131 = vmatprep.subr.bf16.mxu1 %v3189_v28  ;;  %v3300_v28 = vld [vmem:[%s5168_s3 + $0x120] ss:$16 sps:$4 sm:$0xff]  }
  0x37   :  { %450 = vmatpush1.bf16.msra.mxu0 %v3191_v29  ;;  %3147 = vmatpush1.bf16.msra.mxu1 %v3191_v29  ;;  %v3303_v29 = vld [vmem:[%s5168_s3 + $0x128] ss:$16 sps:$4 sm:$0xff]  }
  0x38   :  { %451 = vmatprep.subr.bf16.mxu0 %v3192_v30  ;;  %3132 = vmatprep.subr.bf16.mxu1 %v3192_v30  ;;  %v3308_v30 = vld [vmem:[%s5168_s3 + $0x144] ss:$16 sps:$4 sm:$0xff]  }
  0x3b   :  { %452 = vmatpush1.bf16.msra.mxu0 %v3194_v31  ;;  %3148 = vmatpush1.bf16.msra.mxu1 %v3194_v31  ;;  %v3311_v31 = vld [vmem:[%s5168_s3 + $0x14c] ss:$16 sps:$4 sm:$0xff]  }
  0x3c   :  { %453 = vmatprep.subr.bf16.mxu0 %v3195_v32  ;;  %3133 = vmatprep.subr.bf16.mxu1 %v3195_v32  ;;  %v3215_v32 = vld [vmem:[%s5167_s0 + $0x50] ss:$8 sps:$4 sm:$0xff]  }
  0x3f   :  { %454 = vmatpush1.bf16.msra.mxu0 %v3197_v33  ;;  %3149 = vmatpush1.bf16.msra.mxu1 %v3197_v33  ;;  %v3239_v33 = vld [vmem:[%s5167_s0 + $0xd0] ss:$8 sps:$4 sm:$0xff]  }
  0x40   :  { %1246 = vmatprep.subr.bf16.mxu1 %v3248_v34  ;;  %1439 = vmatprep.subr.bf16.mxu0 %v3251_v36  ;;  %v3216_v34 = vld [vmem:[%s5167_s0 + $0x64] ss:$8 sps:$4 sm:$0xff]   ;;  %v3306_v36 = vld [vmem:[%s5168_s3 + $0x140] ss:$16 sps:$4 sm:$0xff]  }
  0x42   :  { %456 = vmatmul.mubr.bf16.vlgmr.msra.gmra.mrb[0].mxu0 %v3198_v35  ;;  %536 = vmatmul.mubr.bf16.vlgmr.msra.gmra.mrb[0].mxu1 %v3222_v38  ;;  %v3240_v35 = vld [vmem:[%s5167_s0 + $0xe4] ss:$8 sps:$4 sm:$0xff]  }
  0x43   :  { %465 = vmatprep.mubr.bf16.mxu0 %v3201_v37  ;;  %545 = vmatprep.mubr.bf16.mxu1 %v3225_v39  ;;  %v3309_v37 = vld [vmem:[%s5168_s3 + $0x148] ss:$16 sps:$4 sm:$0xff]   ;;  %v3314_v38 = vld [vmem:[%s5168_s3 + $0x164] ss:$16 sps:$4 sm:$0xff]   ;;  %v3317_v39 = vld [vmem:[%s5168_s3 + $0x16c] ss:$16 sps:$4 sm:$0xff]  }
  0x44   :  { %1247 = vmatpush1.bf16.msra.mxu1 %v3246_v40  ;;  %1440 = vmatpush1.bf16.msra.mxu0 %v3249_v41  ;;  %v3312_v40 = vld [vmem:[%s5168_s3 + $0x160] ss:$16 sps:$4 sm:$0xff]   ;;  %v3315_v41 = vld [vmem:[%s5168_s3 + $0x168] ss:$16 sps:$4 sm:$0xff]  }
  0x45   :  { %1248 = vmatprep.subr.bf16.mxu1 %v3254_v42  ;;  %1441 = vmatprep.subr.bf16.mxu0 %v3257_v43  ;;  %v3320_v42 = vld [vmem:[%s5168_s3 + $0x184] ss:$16 sps:$4 sm:$0xff]   ;;  %v3323_v43 = vld [vmem:[%s5168_s3 + $0x18c] ss:$16 sps:$4 sm:$0xff]  }
  0x48   :  { %1249 = vmatpush1.bf16.msra.mxu1 %v3252_v44  ;;  %1442 = vmatpush1.bf16.msra.mxu0 %v3255_v45  ;;  %v3218_v44 = vld [vmem:[%s5167_s0 + $0x60] ss:$8 sps:$4 sm:$0xff]  }
  0x49   :  { %1250 = vmatprep.subr.bf16.mxu1 %v3260_v47  ;;  %1443 = vmatprep.subr.bf16.mxu0 %v3263_v49  ;;  %v3242_v45 = vld [vmem:[%s5167_s0 + $0xe0] ss:$8 sps:$4 sm:$0xff]   ;;  %v3243_v47 = vld [vmem:[%s5167_s0 + $0xf4] ss:$8 sps:$4 sm:$0xff]  }
  0x4a   :  { %466 = vmatmul.mubr.bf16.gmra.mrb[4].mxu0 %v3203_v46  ;;  %546 = vmatmul.mubr.bf16.gmra.mrb[4].mxu1 %v3227_v50  ;;  %v3219_v46 = vld [vmem:[%s5167_s0 + $0x74] ss:$8 sps:$4 sm:$0xff]   ;;  %v3321_v49 = vld [vmem:[%s5168_s3 + $0x188] ss:$16 sps:$4 sm:$0xff]  }
  0x4b   :  { %475 = vmatprep.mubr.bf16.mxu0 %v3204_v48  ;;  %555 = vmatprep.mubr.bf16.mxu1 %v3228_v51  ;;  %v3318_v48 = vld [vmem:[%s5168_s3 + $0x180] ss:$16 sps:$4 sm:$0xff]   ;;  %v3326_v50 = vld [vmem:[%s5168_s3 + $0x1a4] ss:$16 sps:$4 sm:$0xff]  }
  0x4c   :  { %1251 = vmatpush1.bf16.msra.mxu1 %v3258_v52  ;;  %1444 = vmatpush1.bf16.msra.mxu0 %v3261_v53  ;;  %v3324_v51 = vld [vmem:[%s5168_s3 + $0x1a0] ss:$16 sps:$4 sm:$0xff]  }
  0x4d   :  { %1252 = vmatprep.subr.bf16.mxu1 %v3266_v54  ;;  %1445 = vmatprep.subr.bf16.mxu0 %v3269_v55  ;;  %v3221_v52 = vld [vmem:[%s5167_s0 + $0x70] ss:$8 sps:$4 sm:$0xff]   ;;  %v3329_v54 = vld [vmem:[%s5168_s3 + $0x1ac] ss:$16 sps:$4 sm:$0xff]  }
  0x4e   :  { %v3245_v53 = vld [vmem:[%s5167_s0 + $0xf0] ss:$8 sps:$4 sm:$0xff]  }
  0x4f   :  { %v3327_v55 = vld [vmem:[%s5168_s3 + $0x1a8] ss:$16 sps:$4 sm:$0xff]  }
  0x50   :  { %1253 = vmatpush1.bf16.msra.mxu1 %v3264_v56  ;;  %1446 = vmatpush1.bf16.msra.mxu0 %v3267_v57  ;;  %v3332_v56 = vld [vmem:[%s5168_s3 + $0x1c4] ss:$16 sps:$4 sm:$0xff]   ;;  %v3335_v57 = vld [vmem:[%s5168_s3 + $0x1cc] ss:$16 sps:$4 sm:$0xff]  }
  0x51   :  { %1254 = vmatprep.subr.bf16.mxu1 %v3272_v60  ;;  %1447 = vmatprep.subr.bf16.mxu0 %v3275_v62  ;;  %v3338_v60 = vld [vmem:[%s5168_s3 + $0x1e4] ss:$16 sps:$4 sm:$0xff]   ;;  %v3336_v62 = vld [vmem:[%s5168_s3 + $0x1e0] ss:$16 sps:$4 sm:$0xff]  }
  0x52   :  { %476 = vmatmul.mubr.bf16.gmra.mrb[8].mxu0 %v3206_v58  ;;  %556 = vmatmul.mubr.bf16.gmra.mrb[8].mxu1 %v3230_v59  ;;  %v3330_v58 = vld [vmem:[%s5168_s3 + $0x1c0] ss:$16 sps:$4 sm:$0xff]   ;;  %v3333_v59 = vld [vmem:[%s5168_s3 + $0x1c8] ss:$16 sps:$4 sm:$0xff]  }
  0x53   :  { %485 = vmatprep.mubr.bf16.mxu0 %v3207_v61  ;;  %565 = vmatprep.mubr.bf16.mxu1 %v3231_v63  ;;  %v3341_v61 = vld [vmem:[%s5168_s3 + $0x1ec] ss:$16 sps:$4 sm:$0xff]   ;;  %v3339_v63 = vld [vmem:[%s5168_s3 + $0x1e8] ss:$16 sps:$4 sm:$0xff]  }
  0x54   :  { %1255 = vmatpush1.bf16.msra.mxu1 %v3270_v0  ;;  %1448 = vmatpush1.bf16.msra.mxu0 %v3273_v1  ;;  %v3342_v0 = vld [vmem:[%s5169_s5 + $0x40] sm:$0xff]   ;;  %v93_v1 = vlaneseq }
  0x55   :  { %1256 = vmatprep.subr.bf16.mxu1 %v3278_v2  ;;  %1449 = vmatprep.subr.bf16.mxu0 %v3281_v3  ;;  %v3344_v3 = vld [vmem:[%s5169_s5 + $0xc0] sm:$0xff]  }
  0x56   :  { %v3865_v2 = vshrl.u32 %v93_v1, 7 }
  0x58   :  { %1257 = vmatpush1.bf16.msra.mxu1 %v3276_v4  ;;  %1450 = vmatpush1.bf16.msra.mxu0 %v3279_v5  ;;  %v95_v4 = vsub.s32 0, %v3865_v2  ;;  %v99_v5 = vsub.s32 1, %v3865_v2 }
  0x59   :  { %1258 = vmatprep.subr.bf16.mxu1 %v3284_v6  ;;  %1451 = vmatprep.subr.bf16.mxu0 %v3287_v7  ;;  %v91_v6 = vld [vmem:[%s5170_s2] sm:$0x3] }
  0x5a   :  { %486 = vmatmul.mubr.bf16.gmra.mrb[12].mxu0 %v3209_v8  ;;  %566 = vmatmul.mubr.bf16.gmra.mrb[12].mxu1 %v3233_v9  ;;  %v3877_v7 = vrot.slane %v91_v6, %v95_v4  ;;  %v3881_v8 = vrot.slane %v91_v6, %v99_v5 }
  0x5b   :  { %495 = vmatprep.mubr.bf16.mxu0 %v3210_v10  ;;  %575 = vmatprep.mubr.bf16.mxu1 %v3234_v11 }
  0x5c   :  { %1259 = vmatpush1.bf16.msra.mxu1 %v3282_v12  ;;  %1452 = vmatpush1.bf16.msra.mxu0 %v3285_v13 }
  0x5d   :  { %1260 = vmatprep.subr.bf16.mxu1 %v3290_v14  ;;  %1453 = vmatprep.subr.bf16.mxu0 %v3293_v15 }
  0x60   :  { %1261 = vmatpush1.bf16.msra.mxu1 %v3288_v16  ;;  %1454 = vmatpush1.bf16.msra.mxu0 %v3291_v17 }
  0x61   :  { %1262 = vmatprep.subr.bf16.mxu1 %v3296_v18  ;;  %1455 = vmatprep.subr.bf16.mxu0 %v3299_v19 }
  0x62   :  { %496 = vmatmul.mubr.bf16.gmra.mrb[16].mxu0 %v3212_v20  ;;  %576 = vmatmul.mubr.bf16.gmra.mrb[16].mxu1 %v3236_v21 }
  0x63   :  { %505 = vmatprep.mubr.bf16.mxu0 %v3213_v22  ;;  %585 = vmatprep.mubr.bf16.mxu1 %v3237_v23 }
  0x64   :  { %1263 = vmatpush1.bf16.msra.mxu1 %v3294_v24  ;;  %1456 = vmatpush1.bf16.msra.mxu0 %v3297_v25 }
  0x65   :  { %1264 = vmatprep.subr.bf16.mxu1 %v3302_v26  ;;  %1457 = vmatprep.subr.bf16.mxu0 %v3305_v27 }
  0x68   :  { %1265 = vmatpush1.bf16.msra.mxu1 %v3300_v28  ;;  %1458 = vmatpush1.bf16.msra.mxu0 %v3303_v29 }
  0x69   :  { %1266 = vmatprep.subr.bf16.mxu1 %v3308_v30  ;;  %1459 = vmatprep.subr.bf16.mxu0 %v3311_v31 }
  0x6a   :  { %506 = vmatmul.mubr.bf16.gmra.mrb[20].mxu0 %v3215_v32  ;;  %586 = vmatmul.mubr.bf16.gmra.mrb[20].mxu1 %v3239_v33 }
  0x6b   :  { %515 = vmatprep.mubr.bf16.mxu0 %v3216_v34  ;;  %595 = vmatprep.mubr.bf16.mxu1 %v3240_v35  ;;  %v3343_v35 = vld [vmem:[%s5169_s5] sm:$0xff]  }
  0x6c   :  { %1267 = vmatpush1.bf16.msra.mxu1 %v3306_v36  ;;  %1460 = vmatpush1.bf16.msra.mxu0 %v3309_v37 }
  0x6d   :  { %1268 = vmatprep.subr.bf16.mxu1 %v3314_v38  ;;  %1461 = vmatprep.subr.bf16.mxu0 %v3317_v39 }
  0x70   :  { %1269 = vmatpush1.bf16.msra.mxu1 %v3312_v40  ;;  %1462 = vmatpush1.bf16.msra.mxu0 %v3315_v41  ;;  %v3345_v40 = vld [vmem:[%s5169_s5 + $0x80] sm:$0xff]   ;;  %v3346_v41 = vld [vmem:[%s5169_s5 + $0x48] sm:$0xff]  }
  0x71   :  { %1270 = vmatprep.subr.bf16.mxu1 %v3320_v42  ;;  %1463 = vmatprep.subr.bf16.mxu0 %v3323_v43  ;;  %v3348_v42 = vld [vmem:[%s5169_s5 + $0xc8] sm:$0xff]  }
  0x72   :  { %516 = vmatmul.mubr.bf16.gmra.mrb[24].mxu0 %v3218_v44  ;;  %596 = vmatmul.mubr.bf16.gmra.mrb[24].mxu1 %v3242_v45 }
  0x73   :  { %525 = vmatprep.mubr.bf16.mxu0 %v3219_v46  ;;  %605 = vmatprep.mubr.bf16.mxu1 %v3243_v47 }
  0x74   :  { %1271 = vmatpush1.bf16.msra.mxu1 %v3318_v48  ;;  %1464 = vmatpush1.bf16.msra.mxu0 %v3321_v49 }
  0x75   :  { %1272 = vmatprep.subr.bf16.mxu1 %v3326_v50  ;;  %1465 = vmatprep.subr.bf16.mxu0 %v3329_v54 }
  0x78   :  { %1273 = vmatpush1.bf16.msra.mxu1 %v3324_v51  ;;  %1466 = vmatpush1.bf16.msra.mxu0 %v3327_v55 }
  0x79   :  { %1274 = vmatprep.subr.bf16.mxu1 %v3332_v56  ;;  %1467 = vmatprep.subr.bf16.mxu0 %v3335_v57  ;;  %v3347_v56 = vld [vmem:[%s5169_s5 + $0x8] sm:$0xff]  }
  0x7a   :  { %526 = vmatmul.mubr.bf16.gmra.mrb[28].mxu0 %v3221_v52  ;;  %606 = vmatmul.mubr.bf16.gmra.mrb[28].mxu1 %v3245_v53 }
  0x7c   :  { %1275 = vmatpush1.bf16.msra.mxu1 %v3330_v58  ;;  %1468 = vmatpush1.bf16.msra.mxu0 %v3333_v59  ;;  %v3349_v58 = vld [vmem:[%s5169_s5 + $0x88] sm:$0xff]  }
  0x7d   :  { %1276 = vmatprep.subr.bf16.mxu1 %v3338_v60  ;;  %1469 = vmatprep.subr.bf16.mxu0 %v3341_v61 }
  0x80   :  { %1277 = vmatpush1.bf16.msra.mxu1 %v3336_v62  ;;  %1470 = vmatpush1.bf16.msra.mxu0 %v3339_v63  ;;  %v3350_v62 = vld [vmem:[%s5169_s5 + $0x50] sm:$0xff]  }
  0x81   :  { %2894 = vmatprep.subr.bf16.mxu1 %v3342_v0  ;;  %3006 = vmatprep.subr.bf16.mxu0 %v3344_v3  ;;  %v3352_v63 = vld [vmem:[%s5169_s5 + $0xd0] sm:$0xff]  }
 0x115   :  { %v457_v9 = vpop.f32.mrb[0].mxu0  ;;  %v537_v10 = vpop.f32.mrb[0].mxu1 }
 0x116   :  { %v458_v11 = vadd.f32 %v457_v9, %v3877_v7  ;;  %v459_v12 = vpop.f32.mrb[1].mxu0  ;;  %v539_v13 = vpop.f32.mrb[1].mxu1  ;;  %v3888_v25 = vadd.f32 %v537_v10, %v3877_v7 }
 0x117   :  { %v460_v14 = vadd.f32 %v459_v12, %v3881_v8  ;;  %v461_v15 = vpop.f32.mrb[2].mxu0  ;;  %v541_v16 = vpop.f32.mrb[2].mxu1  ;;  %v540_v26 = vadd.f32 %v539_v13, %v3881_v8 }
 0x118   :  { %v680_v17 = vmul.f32 0.2, %v458_v11  ;;  %v462_v18 = vadd.f32 %v461_v15, %v3877_v7  ;;  %v463_v19 = vpop.f32.mrb[3].mxu0  ;;  %v543_v20 = vpop.f32.mrb[3].mxu1  ;;  %vm616_vm0 = vcmp.gt.f32.partialorder %v458_v11, 0.0  ;;  %vm648_vm4 = vcmp.gt.f32.partialorder %v3888_v25, 0.0 }
 0x119   :  { %v681_v21 = vmul.f32 0.2, %v460_v14  ;;  %v464_v22 = vadd.f32 %v463_v19, %v3881_v8  ;;  %vm617_vm1 = vcmp.gt.f32.partialorder %v460_v14, 0.0  ;;  %v544_v33 = vadd.f32 %v543_v20, %v3881_v8  ;;  %v3351_v20 = vld [vmem:[%s5169_s5 + $0x10] sm:$0xff]  }
 0x11a   :  { %vm618_vm2 = vcmp.gt.f32.partialorder %v462_v18, 0.0  ;;  %v682_v23 = vmul.f32 0.2, %v462_v18  ;;  %v744_v27 = vsel %vm616_vm0, %v458_v11, %v680_v17  ;;  %v3908_v45 = vmul.f32 0.2, %v3888_v25 }
 0x11b   :  { %vm619_vm3 = vcmp.gt.f32.partialorder %v464_v22, 0.0  ;;  %v683_v24 = vmul.f32 0.2, %v464_v22  ;;  %v745_v31 = vsel %vm617_vm1, %v460_v14, %v681_v21  ;;  %vm649_vm5 = vcmp.gt.f32.partialorder %v540_v26, 0.0  ;;  %v3353_v21 = vld [vmem:[%s5169_s5 + $0x90] sm:$0xff]  }
 0x11c   :  { %v746_v28 = vsel %vm618_vm2, %v462_v18, %v682_v23  ;;  %v713_v50 = vmul.f32 0.2, %v540_v26  ;;  %v3914_v51 = vadd.f32 %v541_v16, %v3877_v7  ;;  %v715_v55 = vmul.f32 0.2, %v544_v33 }
 0x11d   :  { %v808_v29 = vpack.c.bf16 %v746_v28, %v744_v27  ;;  %v467_v30 = vpop.f32.mrb[4].mxu0  ;;  %v747_v32 = vsel %vm619_vm3, %v464_v22, %v683_v24  ;;  %v547_v34 = vpop.f32.mrb[4].mxu1  ;;  %vm651_vm9 = vcmp.gt.f32.partialorder %v544_v33, 0.0  ;;  %v3354_v22 = vld [vmem:[%s5169_s5 + $0x58] sm:$0xff]  }
 0x11e   :  { %v468_v36 = vadd.f32 %v467_v30, %v3877_v7  ;;  %v469_v37 = vpop.f32.mrb[5].mxu0  ;;  %v809_v38 = vpack.c.bf16 %v747_v32, %v745_v31  ;;  %v549_v39 = vpop.f32.mrb[5].mxu1  ;;  %v3924_v60 = vadd.f32 %v547_v34, %v3877_v7  ;;  %v714_v3 = vmul.f32 0.2, %v3914_v51 }
 0x11f   :  { %v470_v43 = vadd.f32 %v469_v37, %v3881_v8  ;;  %v471_v44 = vpop.f32.mrb[6].mxu0  ;;  %v3910_v46 = vpop.f32.mrb[6].mxu1  ;;  %v3927_v61 = vadd.f32 %v549_v39, %v3881_v8  ;;  %v777_v6 = vsel %vm649_vm5, %v540_v26, %v713_v50  ;;  %v779_v13 = vsel %vm651_vm9, %v544_v33, %v715_v55  ;;  %v3355_v39 = vld [vmem:[%s5169_s5 + $0x18] sm:$0xff]  }
 0x120   :  { %v684_v47 = vmul.f32 0.2, %v468_v36  ;;  %v472_v48 = vadd.f32 %v471_v44, %v3877_v7  ;;  %v473_v49 = vpop.f32.mrb[7].mxu0  ;;  %1278 = vmatprep.mubr.bf16.mxu1 %v809_v38  ;;  %1471 = vmatprep.mubr.bf16.mxu0 %v809_v38  ;;  %v553_v52 = vpop.f32.mrb[7].mxu1  ;;  %vm620_vm6 = vcmp.gt.f32.partialorder %v468_v36, 0.0  ;;  %vm650_vm11 = vcmp.gt.f32.partialorder %v3914_v51, 0.0 }
 0x121   :  { %v685_v53 = vmul.f32 0.2, %v470_v43  ;;  %v474_v54 = vadd.f32 %v473_v49, %v3881_v8  ;;  %1279 = vmatmul.mubr.bf16.vlgmr.msra.gmra.mrb[32].mxu1 %v808_v29  ;;  %1472 = vmatmul.mubr.bf16.vlgmr.msra.gmra.mrb[32].mxu0 %v808_v29  ;;  %vm621_vm7 = vcmp.gt.f32.partialorder %v470_v43, 0.0  ;;  %v554_v18 = vadd.f32 %v553_v52, %v3881_v8  ;;  %v3356_v29 = vld [vmem:[%s5169_s5 + $0xd8] sm:$0xff]   ;;  %v3358_v44 = vld [vmem:[%s5169_s5 + $0x60] sm:$0xff]  }
 0x122   :  { %vm622_vm8 = vcmp.gt.f32.partialorder %v472_v48, 0.0  ;;  %v686_v57 = vmul.f32 0.2, %v472_v48  ;;  %2895 = vmatpush3.bf16.msra.mxu1 %v3343_v35  ;;  %3007 = vmatpush3.bf16.msra.mxu0 %v3345_v40  ;;  %v748_v0 = vsel %vm620_vm6, %v468_v36, %v684_v47  ;;  %v3954_v26 = vmul.f32 0.2, %v3924_v60 }
 0x123   :  { %vm623_vm10 = vcmp.gt.f32.partialorder %v474_v54, 0.0  ;;  %v687_v59 = vmul.f32 0.2, %v474_v54  ;;  %2896 = vmatprep.subr.bf16.mxu1 %v3346_v41  ;;  %3008 = vmatprep.subr.bf16.mxu0 %v3348_v42  ;;  %v749_v10 = vsel %vm621_vm7, %v470_v43, %v685_v53  ;;  %vm653_vm12 = vcmp.gt.f32.partialorder %v3927_v61, 0.0  ;;  %v3357_v43 = vld [vmem:[%s5169_s5 + $0x98] sm:$0xff]  }
 0x124   :  { %v750_v1 = vsel %vm622_vm8, %v472_v48, %v686_v57  ;;  %v3957_v27 = vpack.c.bf16 %v779_v13, %v777_v6  ;;  %v717_v33 = vmul.f32 0.2, %v3927_v61  ;;  %v776_v34 = vsel %vm648_vm4, %v3888_v25, %v3908_v45 }
 0x125   :  { %v477_v9 = vpop.f32.mrb[8].mxu0  ;;  %v751_v11 = vsel %vm623_vm10, %v474_v54, %v687_v59  ;;  %v810_v12 = vpack.c.bf16 %v750_v1, %v748_v0  ;;  %v557_v14 = vpop.f32.mrb[8].mxu1  ;;  %vm652_vm14 = vcmp.gt.f32.partialorder %v3924_v60, 0.0  ;;  %v778_v38 = vsel %vm650_vm11, %v3914_v51, %v714_v3  ;;  %v3360_v0 = vld [vmem:[%s5169_s5 + $0xe0] sm:$0xff]  }
 0x126   :  { %v478_v15 = vadd.f32 %v477_v9, %v3877_v7  ;;  %v479_v16 = vpop.f32.mrb[9].mxu0  ;;  %v811_v17 = vpack.c.bf16 %v751_v11, %v749_v10  ;;  %v559_v19 = vpop.f32.mrb[9].mxu1  ;;  %2897 = vmatpush3.bf16.msra.mxu1 %v3347_v56  ;;  %3009 = vmatpush3.bf16.msra.mxu0 %v3349_v58  ;;  %v719_v40 = vmul.f32 0.2, %v554_v18  ;;  %v3978_v42 = vadd.f32 %v3910_v46, %v3877_v7  ;;  %v3361_v1 = vld [vmem:[%s5169_s5 + $0xa0] sm:$0xff]   ;;  %v3362_v11 = vld [vmem:[%s5169_s5 + $0x68] sm:$0xff]  }
 0x127   :  { %v480_v23 = vadd.f32 %v479_v16, %v3881_v8  ;;  %v481_v24 = vpop.f32.mrb[10].mxu0  ;;  %v561_v28 = vpop.f32.mrb[10].mxu1  ;;  %2898 = vmatprep.subr.bf16.mxu1 %v3350_v62  ;;  %3010 = vmatprep.subr.bf16.mxu0 %v3352_v63  ;;  %vm655_vm2 = vcmp.gt.f32.partialorder %v554_v18, 0.0  ;;  %v3988_v48 = vadd.f32 %v557_v14, %v3877_v7  ;;  %v3990_v49 = vpack.c.bf16 %v778_v38, %v776_v34  ;;  %v3359_v63 = vld [vmem:[%s5169_s5 + $0x20] sm:$0xff]  }
 0x128   :  { %v688_v30 = vmul.f32 0.2, %v478_v15  ;;  %v482_v31 = vadd.f32 %v481_v24, %v3877_v7  ;;  %v483_v32 = vpop.f32.mrb[11].mxu0  ;;  %1288 = vmatprep.mubr.bf16.mxu1 %v811_v17  ;;  %1481 = vmatprep.mubr.bf16.mxu0 %v811_v17  ;;  %v563_v35 = vpop.f32.mrb[11].mxu1  ;;  %vm624_vm13 = vcmp.gt.f32.partialorder %v478_v15, 0.0  ;;  %v3994_v53 = vadd.f32 %v559_v19, %v3881_v8  ;;  %v3364_v17 = vld [vmem:[%s5169_s5 + $0xe8] sm:$0xff]  }
 0x129   :  { %v689_v36 = vmul.f32 0.2, %v480_v23  ;;  %v484_v37 = vadd.f32 %v483_v32, %v3881_v8  ;;  %1289 = vmatmul.mubr.bf16.gmra.mrb[36].mxu1 %v810_v12  ;;  %1482 = vmatmul.mubr.bf16.gmra.mrb[36].mxu0 %v810_v12  ;;  %vm625_vm15 = vcmp.gt.f32.partialorder %v480_v23, 0.0  ;;  %v781_v58 = vsel %vm653_vm12, %v3927_v61, %v717_v33 }
 0x12a   :  { %vm626_vm0 = vcmp.gt.f32.partialorder %v482_v31, 0.0  ;;  %v690_v25 = vmul.f32 0.2, %v482_v31  ;;  %2899 = vmatpush3.bf16.msra.mxu1 %v3351_v20  ;;  %3011 = vmatpush3.bf16.msra.mxu0 %v3353_v21  ;;  %v752_v45 = vsel %vm624_vm13, %v478_v15, %v688_v30  ;;  %v783_v59 = vsel %vm655_vm2, %v554_v18, %v719_v40 }
 0x12b   :  { %vm627_vm1 = vcmp.gt.f32.partialorder %v484_v37, 0.0  ;;  %v691_v41 = vmul.f32 0.2, %v484_v37  ;;  %2900 = vmatprep.subr.bf16.mxu1 %v3354_v22  ;;  %3012 = vmatprep.subr.bf16.mxu0 %v3356_v29  ;;  %v753_v50 = vsel %vm625_vm15, %v480_v23, %v689_v36  ;;  %vm654_vm3 = vcmp.gt.f32.partialorder %v3978_v42, 0.0  ;;  %v3363_v22 = vld [vmem:[%s5169_s5 + $0x28] sm:$0xff]  }
 0x12c   :  { %v754_v47 = vsel %vm626_vm0, %v482_v31, %v690_v25  ;;  %v718_v61 = vmul.f32 0.2, %v3978_v42  ;;  %v4014_v9 = vadd.f32 %v561_v28, %v3877_v7  ;;  %v4021_v15 = vmul.f32 0.2, %v3988_v48  ;;  %v3365_v23 = vld [vmem:[%s5169_s5 + $0xa8] sm:$0xff]  }
 0x12d   :  { %v487_v46 = vpop.f32.mrb[12].mxu0  ;;  %v755_v51 = vsel %vm627_vm1, %v484_v37, %v691_v41  ;;  %v812_v52 = vpack.c.bf16 %v754_v47, %v752_v45  ;;  %v567_v54 = vpop.f32.mrb[12].mxu1  ;;  %v4024_v16 = vadd.f32 %v563_v35, %v3881_v8  ;;  %v4030_v20 = vpack.c.bf16 %v783_v59, %v781_v58  ;;  %v3367_v45 = vld [vmem:[%s5169_s5 + $0x30] sm:$0xff]  }
 0x12e   :  { %v488_v55 = vadd.f32 %v487_v46, %v3877_v7  ;;  %v489_v56 = vpop.f32.mrb[13].mxu0  ;;  %v813_v57 = vpack.c.bf16 %v755_v51, %v753_v50  ;;  %v569_v62 = vpop.f32.mrb[13].mxu1  ;;  %2901 = vmatpush3.bf16.msra.mxu1 %v3355_v39  ;;  %3013 = vmatpush3.bf16.msra.mxu0 %v3357_v43  ;;  %vm656_vm7 = vcmp.gt.f32.partialorder %v3988_v48, 0.0  ;;  %v721_v28 = vmul.f32 0.2, %v3994_v53  ;;  %v3368_v47 = vld [vmem:[%s5169_s5 + $0xf0] sm:$0xff]  }
 0x12f   :  { %v490_v3 = vadd.f32 %v489_v56, %v3881_v8  ;;  %v491_v6 = vpop.f32.mrb[14].mxu0  ;;  %v571_v10 = vpop.f32.mrb[14].mxu1  ;;  %2902 = vmatprep.subr.bf16.mxu1 %v3358_v44  ;;  %3014 = vmatprep.subr.bf16.mxu0 %v3360_v0  ;;  %vm657_vm9 = vcmp.gt.f32.partialorder %v3994_v53, 0.0  ;;  %v4044_v30 = vmul.f32 0.2, %v4014_v9  ;;  %vm658_vm10 = vcmp.gt.f32.partialorder %v4014_v9, 0.0 }
 0x130   :  { %v692_v12 = vmul.f32 0.2, %v488_v55  ;;  %v492_v13 = vadd.f32 %v491_v6, %v3877_v7  ;;  %v493_v14 = vpop.f32.mrb[15].mxu0  ;;  %1298 = vmatprep.mubr.bf16.mxu1 %v813_v57  ;;  %1491 = vmatprep.mubr.bf16.mxu0 %v813_v57  ;;  %vm628_vm4 = vcmp.gt.f32.partialorder %v488_v55, 0.0  ;;  %v4032_v21 = vpop.f32.mrb[15].mxu1  ;;  %v4049_v33 = vadd.f32 %v567_v54, %v3877_v7  ;;  %v3366_v44 = vld [vmem:[%s5169_s5 + $0x70] sm:$0xff]  }
 0x131   :  { %v693_v18 = vmul.f32 0.2, %v490_v3  ;;  %v494_v19 = vadd.f32 %v493_v14, %v3881_v8  ;;  %1299 = vmatmul.mubr.bf16.gmra.mrb[40].mxu1 %v812_v52  ;;  %1492 = vmatmul.mubr.bf16.gmra.mrb[40].mxu0 %v812_v52  ;;  %vm629_vm5 = vcmp.gt.f32.partialorder %v490_v3, 0.0  ;;  %v780_v34 = vsel %vm652_vm14, %v3924_v60, %v3954_v26  ;;  %v3370_v56 = vld [vmem:[%s5169_s5 + $0x78] sm:$0xff]  }
 0x132   :  { %vm630_vm6 = vcmp.gt.f32.partialorder %v492_v13, 0.0  ;;  %v694_v24 = vmul.f32 0.2, %v492_v13  ;;  %2903 = vmatpush3.bf16.msra.mxu1 %v3359_v63  ;;  %3015 = vmatpush3.bf16.msra.mxu0 %v3361_v1  ;;  %v756_v31 = vsel %vm628_vm4, %v488_v55, %v692_v12  ;;  %vm659_vm11 = vcmp.gt.f32.partialorder %v4024_v16, 0.0  ;;  %v3369_v55 = vld [vmem:[%s5169_s5 + $0xb0] sm:$0xff]  }
 0x133   :  { %vm631_vm8 = vcmp.gt.f32.partialorder %v494_v19, 0.0  ;;  %v695_v29 = vmul.f32 0.2, %v494_v19  ;;  %2904 = vmatprep.subr.bf16.mxu1 %v3362_v11  ;;  %3016 = vmatprep.subr.bf16.mxu0 %v3364_v17  ;;  %v757_v36 = vsel %vm629_vm5, %v490_v3, %v693_v18  ;;  %v4061_v43 = vadd.f32 %v569_v62, %v3881_v8  ;;  %v3372_v3 = vld [vmem:[%s5169_s5 + $0xf8] sm:$0xff]  }
 0x134   :  { %v758_v32 = vsel %vm630_vm6, %v492_v13, %v694_v24  ;;  %v782_v60 = vsel %vm654_vm3, %v3978_v42, %v718_v61  ;;  %v723_v51 = vmul.f32 0.2, %v4024_v16  ;;  %v4080_v52 = vadd.f32 %v571_v10, %v3877_v7  ;;  %v3371_v11 = vld [vmem:[%s5169_s5 + $0x38] sm:$0xff]  }
 0x135   :  { %v497_v35 = vpop.f32.mrb[16].mxu0  ;;  %v759_v37 = vsel %vm631_vm8, %v494_v19, %v695_v29  ;;  %v814_v38 = vpack.c.bf16 %v758_v32, %v756_v31  ;;  %v4057_v39 = vpop.f32.mrb[16].mxu1  ;;  %v4077_v42 = vpack.c.bf16 %v782_v60, %v780_v34  ;;  %v4092_v62 = vmul.f32 0.2, %v4049_v33 }
 0x136   :  { %v498_v25 = vadd.f32 %v497_v35, %v3877_v7  ;;  %v499_v40 = vpop.f32.mrb[17].mxu0  ;;  %v815_v41 = vpack.c.bf16 %v759_v37, %v757_v36  ;;  %v579_v26 = vpop.f32.mrb[17].mxu1  ;;  %2905 = vmatpush3.bf16.msra.mxu1 %v3363_v22  ;;  %3017 = vmatpush3.bf16.msra.mxu0 %v3365_v23  ;;  %vm661_vm15 = vcmp.gt.f32.partialorder %v4061_v43, 0.0  ;;  %v4102_v61 = vmul.f32 0.2, %v4061_v43 }
 0x137   :  { %v500_v46 = vadd.f32 %v499_v40, %v3881_v8  ;;  %v501_v50 = vpop.f32.mrb[18].mxu0  ;;  %v4082_v54 = vpop.f32.mrb[18].mxu1  ;;  %v785_v10 = vsel %vm657_vm9, %v3994_v53, %v721_v28  ;;  %2906 = vmatprep.subr.bf16.mxu1 %v3366_v44  ;;  %3018 = vmatprep.subr.bf16.mxu0 %v3368_v47  ;;  %v4111_v13 = vmul.f32 0.2, %v4080_v52  ;;  %v4115_v14 = vadd.f32 %v4032_v21, %v3881_v8  ;;  %v3373_v53 = vld [vmem:[%s5169_s5 + $0xb8] sm:$0xff]  }
 0x138   :  { %v696_v57 = vmul.f32 0.2, %v498_v25  ;;  %v502_v58 = vadd.f32 %v501_v50, %v3877_v7  ;;  %v503_v59 = vpop.f32.mrb[19].mxu0  ;;  %1308 = vmatprep.mubr.bf16.mxu1 %v815_v41  ;;  %1501 = vmatprep.mubr.bf16.mxu0 %v815_v41  ;;  %v4094_v63 = vpop.f32.mrb[19].mxu1  ;;  %vm632_vm12 = vcmp.gt.f32.partialorder %v498_v25, 0.0  ;;  %v787_v22 = vsel %vm659_vm11, %v4024_v16, %v723_v51 }
 0x139   :  { %vm633_vm13 = vcmp.gt.f32.partialorder %v500_v46, 0.0  ;;  %v697_v0 = vmul.f32 0.2, %v500_v46  ;;  %v504_v1 = vadd.f32 %v503_v59, %v3881_v8  ;;  %1309 = vmatmul.mubr.bf16.gmra.mrb[44].mxu1 %v814_v38  ;;  %1502 = vmatmul.mubr.bf16.gmra.mrb[44].mxu0 %v814_v38  ;;  %vm660_vm1 = vcmp.gt.f32.partialorder %v4049_v33, 0.0 }
 0x13a   :  { %vm634_vm14 = vcmp.gt.f32.partialorder %v502_v58, 0.0  ;;  %v698_v6 = vmul.f32 0.2, %v502_v58  ;;  %2907 = vmatpush3.bf16.msra.mxu1 %v3367_v45  ;;  %3019 = vmatpush3.bf16.msra.mxu0 %v3369_v55  ;;  %v760_v18 = vsel %vm632_vm12, %v498_v25, %v696_v57  ;;  %v4127_v28 = vpack.c.bf16 %v787_v22, %v785_v10 }
 0x13b   :  { %vm635_vm0 = vcmp.gt.f32.partialorder %v504_v1, 0.0  ;;  %v699_v12 = vmul.f32 0.2, %v504_v1  ;;  %v761_v17 = vsel %vm633_vm13, %v500_v46, %v697_v0  ;;  %2908 = vmatprep.subr.bf16.mxu1 %v3370_v56  ;;  %v784_v29 = vsel %vm656_vm7, %v3988_v48, %v4021_v15  ;;  %3020 = vmatprep.subr.bf16.mxu0 %v3372_v3 }
 0x13c   :  { %v762_v19 = vsel %vm634_vm14, %v502_v58, %v698_v6  ;;  %vm662_vm2 = vcmp.gt.f32.partialorder %v4080_v52, 0.0  ;;  %v4137_v16 = vadd.f32 %v4057_v39, %v3877_v7  ;;  %v4140_v36 = vadd.f32 %v579_v26, %v3881_v8 }
 0x13d   :  { %v507_v23 = vpop.f32.mrb[20].mxu0  ;;  %v763_v21 = vsel %vm635_vm0, %v504_v1, %v699_v12  ;;  %v816_v24 = vpack.c.bf16 %v762_v19, %v760_v18  ;;  %v587_v31 = vpop.f32.mrb[20].mxu1  ;;  %vm663_vm3 = vcmp.gt.f32.partialorder %v4115_v14, 0.0  ;;  %v727_v48 = vmul.f32 0.2, %v4115_v14 }
 0x13e   :  { %v508_v32 = vadd.f32 %v507_v23, %v3877_v7  ;;  %v509_v34 = vpop.f32.mrb[21].mxu0  ;;  %v817_v35 = vpack.c.bf16 %v763_v21, %v761_v17  ;;  %v589_v37 = vpop.f32.mrb[21].mxu1  ;;  %v786_v15 = vsel %vm658_vm10, %v4014_v9, %v4044_v30  ;;  %2909 = vmatpush3.bf16.msra.mxu1 %v3371_v11  ;;  %3021 = vmatpush3.bf16.msra.mxu0 %v3373_v53  ;;  %v4162_v46 = vmul.f32 0.2, %v4137_v16 }
 0x13f   :  { %v510_v38 = vadd.f32 %v509_v34, %v3881_v8  ;;  %v511_v25 = vpop.f32.mrb[22].mxu0  ;;  %v4149_v40 = vpop.f32.mrb[22].mxu1  ;;  %v4152_v26 = vpack.c.bf16 %v786_v15, %v784_v29  ;;  %v4159_v9 = vadd.f32 %v4082_v54, %v3877_v7  ;;  %vm665_vm7 = vcmp.gt.f32.partialorder %v4140_v36, 0.0 }
 0x140   :  { %vm636_vm4 = vcmp.gt.f32.partialorder %v508_v32, 0.0  ;;  %v700_v39 = vmul.f32 0.2, %v508_v32  ;;  %v512_v41 = vadd.f32 %v511_v25, %v3877_v7  ;;  %v513_v60 = vpop.f32.mrb[23].mxu0  ;;  %1318 = vmatprep.mubr.bf16.mxu1 %v817_v35  ;;  %1511 = vmatprep.mubr.bf16.mxu0 %v817_v35  ;;  %v4154_v44 = vpop.f32.mrb[23].mxu1  ;;  %v584_v55 = vadd.f32 %v4094_v63, %v3881_v8 }
 0x141   :  { %vm637_vm5 = vcmp.gt.f32.partialorder %v510_v38, 0.0  ;;  %v701_v45 = vmul.f32 0.2, %v510_v38  ;;  %v514_v47 = vadd.f32 %v513_v60, %v3881_v8  ;;  %1319 = vmatmul.mubr.bf16.gmra.mrb[48].mxu1 %v816_v24  ;;  %1512 = vmatmul.mubr.bf16.gmra.mrb[48].mxu0 %v816_v24  ;;  %v729_v51 = vmul.f32 0.2, %v4140_v36 }
 0x142   :  { %vm638_vm6 = vcmp.gt.f32.partialorder %v512_v41, 0.0  ;;  %v702_v30 = vmul.f32 0.2, %v512_v41  ;;  %v764_v57 = vsel %vm636_vm4, %v508_v32, %v700_v39  ;;  %v4170_v54 = vmul.f32 0.2, %v4159_v9 }
 0x143   :  { %vm639_vm8 = vcmp.gt.f32.partialorder %v514_v47, 0.0  ;;  %v703_v50 = vmul.f32 0.2, %v514_v47  ;;  %v765_v56 = vsel %vm637_vm5, %v510_v38, %v701_v45  ;;  %v789_v3 = vsel %vm661_vm15, %v4061_v43, %v4102_v61 }
 0x144   :  { %v766_v58 = vsel %vm638_vm6, %v512_v41, %v702_v30  ;;  %v791_v6 = vsel %vm663_vm3, %v4115_v14, %v727_v48  ;;  %v4185_v17 = vadd.f32 %v587_v31, %v3877_v7  ;;  %vm667_vm9 = vcmp.gt.f32.partialorder %v584_v55, 0.0 }
 0x145   :  { %v517_v59 = vpop.f32.mrb[24].mxu0  ;;  %v767_v0 = vsel %vm639_vm8, %v514_v47, %v703_v50  ;;  %v818_v1 = vpack.c.bf16 %v766_v58, %v764_v57  ;;  %v4179_v63 = vpop.f32.mrb[24].mxu1  ;;  %v4182_v53 = vpack.c.bf16 %v791_v6, %v789_v3  ;;  %v731_v61 = vmul.f32 0.2, %v584_v55 }
 0x146   :  { %v518_v10 = vadd.f32 %v517_v59, %v3877_v7  ;;  %v519_v11 = vpop.f32.mrb[25].mxu0  ;;  %v819_v12 = vpack.c.bf16 %v767_v0, %v765_v56  ;;  %v4187_v18 = vpop.f32.mrb[25].mxu1  ;;  %v4191_v14 = vadd.f32 %v589_v37, %v3881_v8  ;;  %v788_v29 = vsel %vm660_vm1, %v4049_v33, %v4092_v62 }
 0x147   :  { %v520_v19 = vadd.f32 %v519_v11, %v3881_v8  ;;  %v521_v43 = vpop.f32.mrb[26].mxu0  ;;  %v4193_v22 = vpop.f32.mrb[26].mxu1  ;;  %vm664_vm12 = vcmp.gt.f32.partialorder %v4137_v16, 0.0  ;;  %v790_v35 = vsel %vm662_vm2, %v4080_v52, %v4111_v13  ;;  %vm666_vm14 = vcmp.gt.f32.partialorder %v4159_v9, 0.0 }
 0x148   :  { %vm640_vm10 = vcmp.gt.f32.partialorder %v518_v10, 0.0  ;;  %v704_v23 = vmul.f32 0.2, %v518_v10  ;;  %v522_v21 = vadd.f32 %v521_v43, %v3877_v7  ;;  %v523_v24 = vpop.f32.mrb[27].mxu0  ;;  %1328 = vmatprep.mubr.bf16.mxu1 %v819_v12  ;;  %1521 = vmatprep.mubr.bf16.mxu0 %v819_v12  ;;  %v4200_v31 = vpop.f32.mrb[27].mxu1  ;;  %vm669_vm0 = vcmp.gt.f32.partialorder %v4191_v14, 0.0 }
 0x149   :  { %vm641_vm11 = vcmp.gt.f32.partialorder %v520_v19, 0.0  ;;  %v705_v32 = vmul.f32 0.2, %v520_v19  ;;  %v524_v34 = vadd.f32 %v523_v24, %v3881_v8  ;;  %1329 = vmatmul.mubr.bf16.gmra.mrb[52].mxu1 %v818_v1  ;;  %1522 = vmatmul.mubr.bf16.gmra.mrb[52].mxu0 %v818_v1  ;;  %v4211_v33 = vmul.f32 0.2, %v4185_v17 }
 0x14a   :  { %vm642_vm13 = vcmp.gt.f32.partialorder %v522_v21, 0.0  ;;  %v706_v37 = vmul.f32 0.2, %v522_v21  ;;  %v768_v38 = vsel %vm640_vm10, %v518_v10, %v704_v23  ;;  %v733_v48 = vmul.f32 0.2, %v4191_v14 }
 0x14b   :  { %vm643_vm15 = vcmp.gt.f32.partialorder %v524_v34, 0.0  ;;  %v707_v62 = vmul.f32 0.2, %v524_v34  ;;  %v769_v25 = vsel %vm641_vm11, %v520_v19, %v705_v32  ;;  %v4215_v39 = vpack.c.bf16 %v790_v35, %v788_v29 }
 0x14c   :  { %v770_v15 = vsel %vm642_vm13, %v522_v21, %v706_v37  ;;  %v4219_v52 = vadd.f32 %v4149_v40, %v3877_v7  ;;  %v594_v13 = vadd.f32 %v4154_v44, %v3881_v8  ;;  %v793_v47 = vsel %vm665_vm7, %v4140_v36, %v729_v51 }
 0x14d   :  { %v527_v41 = vpop.f32.mrb[28].mxu0  ;;  %v771_v60 = vsel %vm643_vm15, %v524_v34, %v707_v62  ;;  %v820_v45 = vpack.c.bf16 %v770_v15, %v768_v38  ;;  %v795_v30 = vsel %vm667_vm9, %v584_v55, %v731_v61  ;;  %v607_v50 = vpop.f32.mrb[28].mxu1  ;;  %vm668_vm1 = vcmp.gt.f32.partialorder %v4185_v17, 0.0 }
 0x14e   :  { %v528_v56 = vadd.f32 %v527_v41, %v3877_v7  ;;  %v529_v57 = vpop.f32.mrb[29].mxu0  ;;  %v821_v58 = vpack.c.bf16 %v771_v60, %v769_v25  ;;  %vm670_vm2 = vcmp.gt.f32.partialorder %v4219_v52, 0.0  ;;  %v734_v40 = vmul.f32 0.2, %v4219_v52  ;;  %v609_v44 = vpop.f32.mrb[29].mxu1 }
 0x14f   :  { %v530_v59 = vadd.f32 %v529_v57, %v3881_v8  ;;  %v531_v0 = vpop.f32.mrb[30].mxu0  ;;  %vm671_vm3 = vcmp.gt.f32.partialorder %v594_v13, 0.0  ;;  %v735_v1 = vmul.f32 0.2, %v594_v13  ;;  %v4232_v36 = vpack.c.bf16 %v795_v30, %v793_v47  ;;  %v611_v51 = vpop.f32.mrb[30].mxu1 }
 0x150   :  { %vm644_vm4 = vcmp.gt.f32.partialorder %v528_v56, 0.0  ;;  %v708_v55 = vmul.f32 0.2, %v528_v56  ;;  %v532_v3 = vadd.f32 %v531_v0, %v3877_v7  ;;  %v533_v6 = vpop.f32.mrb[31].mxu0  ;;  %1338 = vmatprep.mubr.bf16.mxu1 %v821_v58  ;;  %1531 = vmatprep.mubr.bf16.mxu0 %v821_v58  ;;  %v598_v10 = vadd.f32 %v4179_v63, %v3877_v7  ;;  %v613_v11 = vpop.f32.mrb[31].mxu1 }
 0x151   :  { %vm645_vm5 = vcmp.gt.f32.partialorder %v530_v59, 0.0  ;;  %v709_v12 = vmul.f32 0.2, %v530_v59  ;;  %v534_v19 = vadd.f32 %v533_v6, %v3881_v8  ;;  %1339 = vmatmul.mubr.bf16.gmra.mrb[56].mxu1 %v820_v45  ;;  %1532 = vmatmul.mubr.bf16.gmra.mrb[56].mxu0 %v820_v45  ;;  %v600_v43 = vadd.f32 %v4187_v18, %v3881_v8 }
 0x152   :  { %vm646_vm6 = vcmp.gt.f32.partialorder %v532_v3, 0.0  ;;  %v710_v61 = vmul.f32 0.2, %v532_v3  ;;  %v772_v23 = vsel %vm644_vm4, %v528_v56, %v708_v55  ;;  %vm672_vm7 = vcmp.gt.f32.partialorder %v598_v10, 0.0 }
 0x153   :  { %vm647_vm8 = vcmp.gt.f32.partialorder %v534_v19, 0.0  ;;  %v711_v21 = vmul.f32 0.2, %v534_v19  ;;  %v773_v24 = vsel %vm645_vm5, %v530_v59, %v709_v12  ;;  %v736_v29 = vmul.f32 0.2, %v598_v10 }
 0x154   :  { %v774_v63 = vsel %vm646_vm6, %v532_v3, %v710_v61  ;;  %vm673_vm9 = vcmp.gt.f32.partialorder %v600_v43, 0.0  ;;  %v737_v32 = vmul.f32 0.2, %v600_v43  ;;  %v792_v34 = vsel %vm664_vm12, %v4137_v16, %v4162_v46 }
 0x155   :  { %v775_v35 = vsel %vm647_vm8, %v534_v19, %v711_v21  ;;  %v822_v37 = vpack.c.bf16 %v774_v63, %v772_v23  ;;  %v794_v18 = vsel %vm666_vm14, %v4159_v9, %v4170_v54  ;;  %v602_v38 = vadd.f32 %v4193_v22, %v3877_v7 }
 0x156   :  { %v823_v62 = vpack.c.bf16 %v775_v35, %v773_v24  ;;  %v832_v25 = vpack.c.bf16 %v794_v18, %v792_v34  ;;  %v604_v15 = vadd.f32 %v4200_v31, %v3881_v8  ;;  %v797_v41 = vsel %vm669_vm0, %v4191_v14, %v733_v48 }
 0x157   :  { %vm674_vm10 = vcmp.gt.f32.partialorder %v602_v38, 0.0  ;;  %v738_v16 = vmul.f32 0.2, %v602_v38  ;;  %v799_v46 = vsel %vm671_vm3, %v594_v13, %v735_v1  ;;  %v608_v60 = vadd.f32 %v607_v50, %v3877_v7 }
 0x158   :  { %1348 = vmatprep.mubr.bf16.mxu1 %v823_v62  ;;  %1541 = vmatprep.mubr.bf16.mxu0 %v823_v62  ;;  %vm675_vm11 = vcmp.gt.f32.partialorder %v604_v15, 0.0  ;;  %v739_v9 = vmul.f32 0.2, %v604_v15  ;;  %v835_v54 = vpack.c.bf16 %v799_v46, %v797_v41  ;;  %v610_v22 = vadd.f32 %v609_v44, %v3881_v8 }
 0x159   :  { %1349 = vmatmul.mubr.bf16.gmra.mrb[60].mxu1 %v822_v37  ;;  %1542 = vmatmul.mubr.bf16.gmra.mrb[60].mxu0 %v822_v37  ;;  %vm676_vm12 = vcmp.gt.f32.partialorder %v608_v60, 0.0  ;;  %v740_v31 = vmul.f32 0.2, %v608_v60  ;;  %v796_v14 = vsel %vm668_vm1, %v4185_v17, %v4211_v33  ;;  %v798_v48 = vsel %vm670_vm2, %v4219_v52, %v734_v40 }
 0x15a   :  { %1358 = vmatprep.mubr.bf16.mxu1 %v3957_v27  ;;  %1551 = vmatprep.mubr.bf16.mxu0 %v3957_v27  ;;  %vm677_vm13 = vcmp.gt.f32.partialorder %v610_v22, 0.0  ;;  %v741_v13 = vmul.f32 0.2, %v610_v22  ;;  %v834_v45 = vpack.c.bf16 %v798_v48, %v796_v14  ;;  %v612_v47 = vadd.f32 %v611_v51, %v3877_v7 }
 0x15b   :  { %v614_v30 = vadd.f32 %v613_v11, %v3881_v8  ;;  %v801_v50 = vsel %vm673_vm9, %v600_v43, %v737_v32  ;;  %v803_v56 = vsel %vm675_vm11, %v604_v15, %v739_v9  ;;  %v800_v17 = vsel %vm672_vm7, %v598_v10, %v736_v29 }
 0x15c   :  { %vm678_vm14 = vcmp.gt.f32.partialorder %v612_v47, 0.0  ;;  %v742_v33 = vmul.f32 0.2, %v612_v47  ;;  %v837_v52 = vpack.c.bf16 %v803_v56, %v801_v50  ;;  %v802_v57 = vsel %vm674_vm10, %v602_v38, %v738_v16 }
 0x15d   :  { %vm679_vm15 = vcmp.gt.f32.partialorder %v614_v30, 0.0  ;;  %v743_v27 = vmul.f32 0.2, %v614_v30  ;;  %v836_v58 = vpack.c.bf16 %v802_v57, %v800_v17  ;;  %v805_v40 = vsel %vm677_vm13, %v610_v22, %v741_v13 }
 0x15e   :  { %v804_v44 = vsel %vm676_vm12, %v608_v60, %v740_v31  ;;  %v806_v7 = vsel %vm678_vm14, %v612_v47, %v742_v33 }
 0x15f   :  { %v807_v59 = vsel %vm679_vm15, %v614_v30, %v743_v27  ;;  %v838_v8 = vpack.c.bf16 %v806_v7, %v804_v44 }
 0x160   :  { %v839_v0 = vpack.c.bf16 %v807_v59, %v805_v40 }
 0x161   :  { %1359 = vmatmul.mubr.bf16.gmra.mrb[64].mxu1 %v3990_v49  ;;  %1552 = vmatmul.mubr.bf16.gmra.mrb[64].mxu0 %v3990_v49  ;;  %v916_v49 = vsub.s32 2, %v3865_v2 }
 0x162   :  { %1368 = vmatprep.mubr.bf16.mxu1 %v4030_v20  ;;  %1561 = vmatprep.mubr.bf16.mxu0 %v4030_v20  ;;  %v904_v20 = vld [vmem:[%s5171_s4] sm:$0xf] }
 0x169   :  { %1369 = vmatmul.mubr.bf16.gmra.mrb[68].mxu1 %v4077_v42  ;;  %1562 = vmatmul.mubr.bf16.gmra.mrb[68].mxu0 %v4077_v42  ;;  %v920_v42 = vsub.s32 3, %v3865_v2 }
 0x16a   :  { %1378 = vmatprep.mubr.bf16.mxu1 %v4127_v28  ;;  %1571 = vmatprep.mubr.bf16.mxu0 %v4127_v28  ;;  %v4298_v28 = vrot.slane %v904_v20, %v95_v4 }
 0x171   :  { %1379 = vmatmul.mubr.bf16.gmra.mrb[72].mxu1 %v4152_v26  ;;  %1572 = vmatmul.mubr.bf16.gmra.mrb[72].mxu0 %v4152_v26  ;;  %v4300_v26 = vrot.slane %v904_v20, %v916_v49 }
 0x172   :  { %1388 = vmatprep.mubr.bf16.mxu1 %v4182_v53  ;;  %1581 = vmatprep.mubr.bf16.mxu0 %v4182_v53  ;;  %v4304_v53 = vrot.slane %v904_v20, %v99_v5 }
 0x179   :  { %1389 = vmatmul.mubr.bf16.gmra.mrb[76].mxu1 %v4215_v39  ;;  %1582 = vmatmul.mubr.bf16.gmra.mrb[76].mxu0 %v4215_v39  ;;  %v4306_v39 = vrot.slane %v904_v20, %v920_v42 }
 0x17a   :  { %1398 = vmatprep.mubr.bf16.mxu1 %v4232_v36  ;;  %1591 = vmatprep.mubr.bf16.mxu0 %v4232_v36 }
 0x181   :  { %1399 = vmatmul.mubr.bf16.gmra.mrb[80].mxu1 %v832_v25  ;;  %1592 = vmatmul.mubr.bf16.gmra.mrb[80].mxu0 %v832_v25 }
 0x182   :  { %1408 = vmatprep.mubr.bf16.mxu1 %v835_v54  ;;  %1601 = vmatprep.mubr.bf16.mxu0 %v835_v54 }
 0x189   :  { %1409 = vmatmul.mubr.bf16.gmra.mrb[84].mxu1 %v834_v45  ;;  %1602 = vmatmul.mubr.bf16.gmra.mrb[84].mxu0 %v834_v45 }
 0x18a   :  { %1418 = vmatprep.mubr.bf16.mxu1 %v837_v52  ;;  %1611 = vmatprep.mubr.bf16.mxu0 %v837_v52 }
 0x191   :  { %1419 = vmatmul.mubr.bf16.gmra.mrb[88].mxu1 %v836_v58  ;;  %1612 = vmatmul.mubr.bf16.gmra.mrb[88].mxu0 %v836_v58 }
 0x192   :  { %1428 = vmatprep.mubr.bf16.mxu1 %v839_v0  ;;  %1621 = vmatprep.mubr.bf16.mxu0 %v839_v0 }
 0x199   :  { %1429 = vmatmul.mubr.bf16.gmra.mrb[92].mxu1 %v838_v8  ;;  %1622 = vmatmul.mubr.bf16.gmra.mrb[92].mxu0 %v838_v8 }
 0x1f4   :  { %v1280_v1 = vpop.f32.mrb[32].mxu1  ;;  %v1473_v36 = vpop.f32.mrb[32].mxu0 }
 0x1f5   :  { %v1281_v51 = vadd.f32 %v1280_v1, %v4298_v28  ;;  %v1474_v55 = vadd.f32 %v1473_v36, %v4300_v26  ;;  %v1282_v3 = vpop.f32.mrb[33].mxu1  ;;  %v1475_v6 = vpop.f32.mrb[33].mxu0 }
 0x1f6   :  { %v1283_v10 = vadd.f32 %v1282_v3, %v4304_v53  ;;  %v1476_v4 = vadd.f32 %v1475_v6, %v4306_v39  ;;  %v1284_v11 = vpop.f32.mrb[34].mxu1  ;;  %v1477_v12 = vpop.f32.mrb[34].mxu0 }
 0x1f7   :  { %vm1632_vm0 = vcmp.gt.f32.partialorder %v1281_v51, 0.0  ;;  %v1760_v2 = vmul.f32 0.2, %v1281_v51  ;;  %vm1634_vm1 = vcmp.gt.f32.partialorder %v1474_v55, 0.0  ;;  %v1762_v5 = vmul.f32 0.2, %v1474_v55 }
 0x1f8   :  { %vm1633_vm2 = vcmp.gt.f32.partialorder %v1283_v10, 0.0  ;;  %v1761_v19 = vmul.f32 0.2, %v1283_v10  ;;  %v1285_v43 = vadd.f32 %v1284_v11, %v4298_v28  ;;  %v1478_v61 = vadd.f32 %v1477_v12, %v4300_v26  ;;  %v1286_v23 = vpop.f32.mrb[35].mxu1  ;;  %v1479_v21 = vpop.f32.mrb[35].mxu0 }
 0x1f9   :  { %vm1635_vm3 = vcmp.gt.f32.partialorder %v1476_v4, 0.0  ;;  %v1763_v24 = vmul.f32 0.2, %v1476_v4  ;;  %v1287_v29 = vadd.f32 %v1286_v23, %v4304_v53  ;;  %v1480_v63 = vadd.f32 %v1479_v21, %v4306_v39 }
 0x1fa   :  { %vm1636_vm4 = vcmp.gt.f32.partialorder %v1285_v43, 0.0  ;;  %v1764_v32 = vmul.f32 0.2, %v1285_v43  ;;  %vm1638_vm5 = vcmp.gt.f32.partialorder %v1478_v61, 0.0  ;;  %v1766_v34 = vmul.f32 0.2, %v1478_v61 }
 0x1fb   :  { %vm1637_vm6 = vcmp.gt.f32.partialorder %v1287_v29, 0.0  ;;  %v1765_v35 = vmul.f32 0.2, %v1287_v29  ;;  %vm1639_vm7 = vcmp.gt.f32.partialorder %v1480_v63, 0.0  ;;  %v1767_v37 = vmul.f32 0.2, %v1480_v63 }
 0x1fc   :  { %v1888_v18 = vsel %vm1632_vm0, %v1281_v51, %v1760_v2  ;;  %v1890_v38 = vsel %vm1634_vm1, %v1474_v55, %v1762_v5  ;;  %v1892_v62 = vsel %vm1636_vm4, %v1285_v43, %v1764_v32  ;;  %v1894_v25 = vsel %vm1638_vm5, %v1478_v61, %v1766_v34  ;;  %v1290_v15 = vpop.f32.mrb[36].mxu1  ;;  %v1483_v41 = vpop.f32.mrb[36].mxu0 }
 0x1fd   :  { %v2016_v16 = vpack.c.bf16 %v1892_v62, %v1888_v18  ;;  %v2018_v46 = vpack.c.bf16 %v1894_v25, %v1890_v38  ;;  %v1291_v60 = vadd.f32 %v1290_v15, %v4298_v28  ;;  %v1292_v9 = vpop.f32.mrb[37].mxu1  ;;  %v1485_v54 = vpop.f32.mrb[37].mxu0  ;;  %v1893_v13 = vsel %vm1637_vm6, %v1287_v29, %v1765_v35 }
 0x1fe   :  { %v1293_v22 = vadd.f32 %v1292_v9, %v4304_v53  ;;  %v1486_v31 = vadd.f32 %v1485_v54, %v4306_v39  ;;  %v1294_v14 = vpop.f32.mrb[38].mxu1  ;;  %v1487_v48 = vpop.f32.mrb[38].mxu0  ;;  %v1895_v45 = vsel %vm1639_vm7, %v1480_v63, %v1767_v37  ;;  %v1889_v47 = vsel %vm1633_vm2, %v1283_v10, %v1761_v19 }
 0x1ff   :  { %v1891_v30 = vsel %vm1635_vm3, %v1476_v4, %v1763_v24  ;;  %v1768_v50 = vmul.f32 0.2, %v1291_v60  ;;  %v1484_v56 = vadd.f32 %v1483_v41, %v4300_v26  ;;  %v1295_v33 = vadd.f32 %v1294_v14, %v4298_v28  ;;  %v1296_v57 = vpop.f32.mrb[39].mxu1  ;;  %v1489_v27 = vpop.f32.mrb[39].mxu0 }
 0x200   :  { %vm1641_vm8 = vcmp.gt.f32.partialorder %v1293_v22, 0.0  ;;  %v1769_v17 = vmul.f32 0.2, %v1293_v22  ;;  %v1488_v52 = vadd.f32 %v1487_v48, %v4300_v26  ;;  %v2017_v58 = vpack.c.bf16 %v1893_v13, %v1889_v47 }
 0x201   :  { %v2019_v40 = vpack.c.bf16 %v1895_v45, %v1891_v30  ;;  %vm1643_vm9 = vcmp.gt.f32.partialorder %v1486_v31, 0.0  ;;  %v1771_v44 = vmul.f32 0.2, %v1486_v31  ;;  %v1297_v7 = vadd.f32 %v1296_v57, %v4304_v53 }
 0x202   :  { %v1490_v59 = vadd.f32 %v1489_v27, %v4306_v39  ;;  %vm1644_vm10 = vcmp.gt.f32.partialorder %v1295_v33, 0.0  ;;  %v1772_v8 = vmul.f32 0.2, %v1295_v33  ;;  %vm1646_vm11 = vcmp.gt.f32.partialorder %v1488_v52, 0.0  ;;  %2375 = vmatprep.mubr.bf16.mxu1 %v2017_v58 }
 0x203   :  { %v1774_v0 = vmul.f32 0.2, %v1488_v52  ;;  %2536 = vmatprep.mubr.bf16.mxu0 %v2019_v40  ;;  %vm1645_vm12 = vcmp.gt.f32.partialorder %v1297_v7, 0.0  ;;  %v1773_v49 = vmul.f32 0.2, %v1297_v7  ;;  %2376 = vmatmul.mubr.bf16.vlgmr.msra.gmra.mrb[96].mxu1 %v2016_v16  ;;  %vm1640_vm14 = vcmp.gt.f32.partialorder %v1291_v60, 0.0 }
 0x204   :  { %vm1647_vm13 = vcmp.gt.f32.partialorder %v1490_v59, 0.0  ;;  %v1775_v20 = vmul.f32 0.2, %v1490_v59  ;;  %2537 = vmatmul.mubr.bf16.vlgmr.msra.gmra.mrb[96].mxu0 %v2018_v46  ;;  %vm1642_vm15 = vcmp.gt.f32.partialorder %v1484_v56, 0.0  ;;  %v1770_v42 = vmul.f32 0.2, %v1484_v56 }
 0x205   :  { %v1300_v1 = vpop.f32.mrb[40].mxu1  ;;  %v1493_v36 = vpop.f32.mrb[40].mxu0  ;;  %v1897_v51 = vsel %vm1641_vm8, %v1293_v22, %v1769_v17  ;;  %v1901_v6 = vsel %vm1645_vm12, %v1297_v7, %v1773_v49  ;;  %v1899_v10 = vsel %vm1643_vm9, %v1486_v31, %v1771_v44  ;;  %v1900_v11 = vsel %vm1644_vm10, %v1295_v33, %v1772_v8 }
 0x206   :  { %v1302_v55 = vpop.f32.mrb[41].mxu1  ;;  %v1495_v3 = vpop.f32.mrb[41].mxu0  ;;  %v1903_v4 = vsel %vm1647_vm13, %v1490_v59, %v1775_v20  ;;  %v2021_v19 = vpack.c.bf16 %v1901_v6, %v1897_v51  ;;  %v1902_v61 = vsel %vm1646_vm11, %v1488_v52, %v1774_v0  ;;  %v1896_v21 = vsel %vm1640_vm14, %v1291_v60, %v1768_v50 }
 0x207   :  { %v1303_v12 = vadd.f32 %v1302_v55, %v4304_v53  ;;  %v1304_v2 = vpop.f32.mrb[42].mxu1  ;;  %v1497_v5 = vpop.f32.mrb[42].mxu0  ;;  %v2023_v43 = vpack.c.bf16 %v1903_v4, %v1899_v10  ;;  %v1496_v23 = vadd.f32 %v1495_v3, %v4306_v39  ;;  %v1898_v24 = vsel %vm1642_vm15, %v1484_v56, %v1770_v42 }
 0x208   :  { %2383 = vmatprep.mubr.bf16.mxu1 %v2021_v19  ;;  %v1301_v29 = vadd.f32 %v1300_v1, %v4298_v28  ;;  %v1305_v63 = vadd.f32 %v1304_v2, %v4298_v28  ;;  %v1306_v32 = vpop.f32.mrb[43].mxu1  ;;  %v1499_v34 = vpop.f32.mrb[43].mxu0  ;;  %v2020_v35 = vpack.c.bf16 %v1900_v11, %v1896_v21  ;;  %v2022_v37 = vpack.c.bf16 %v1902_v61, %v1898_v24 }
 0x209   :  { %2544 = vmatprep.mubr.bf16.mxu0 %v2023_v43  ;;  %v1777_v18 = vmul.f32 0.2, %v1303_v12  ;;  %v1307_v38 = vadd.f32 %v1306_v32, %v4304_v53  ;;  %v1500_v62 = vadd.f32 %v1499_v34, %v4306_v39  ;;  %v1494_v41 = vadd.f32 %v1493_v36, %v4300_v26 }
 0x20a   :  { %v1779_v16 = vmul.f32 0.2, %v1496_v23  ;;  %vm1652_vm0 = vcmp.gt.f32.partialorder %v1305_v63, 0.0  ;;  %v1780_v46 = vmul.f32 0.2, %v1305_v63  ;;  %vm1649_vm3 = vcmp.gt.f32.partialorder %v1303_v12, 0.0 }
 0x20b   :  { %2384 = vmatmul.mubr.bf16.gmra.mrb[100].mxu1 %v2020_v35  ;;  %vm1653_vm1 = vcmp.gt.f32.partialorder %v1307_v38, 0.0  ;;  %v1781_v60 = vmul.f32 0.2, %v1307_v38  ;;  %vm1655_vm2 = vcmp.gt.f32.partialorder %v1500_v62, 0.0  ;;  %v1783_v9 = vmul.f32 0.2, %v1500_v62 }
 0x20c   :  { %v1310_v25 = vpop.f32.mrb[44].mxu1  ;;  %v1503_v15 = vpop.f32.mrb[44].mxu0  ;;  %2545 = vmatmul.mubr.bf16.gmra.mrb[100].mxu0 %v2022_v37  ;;  %v1776_v54 = vmul.f32 0.2, %v1301_v29  ;;  %vm1651_vm4 = vcmp.gt.f32.partialorder %v1496_v23, 0.0  ;;  %v1498_v22 = vadd.f32 %v1497_v5, %v4300_v26  ;;  %vm1648_vm5 = vcmp.gt.f32.partialorder %v1301_v29, 0.0 }
 0x20d   :  { %v1312_v31 = vpop.f32.mrb[45].mxu1  ;;  %v1505_v14 = vpop.f32.mrb[45].mxu0  ;;  %v1909_v45 = vsel %vm1653_vm1, %v1307_v38, %v1781_v60  ;;  %v1911_v47 = vsel %vm1655_vm2, %v1500_v62, %v1783_v9  ;;  %vm1650_vm6 = vcmp.gt.f32.partialorder %v1494_v41, 0.0  ;;  %v4345_v30 = vadd.f32 %v1310_v25, %v4298_v28 }
 0x20e   :  { %v1314_v48 = vpop.f32.mrb[46].mxu1  ;;  %v1507_v13 = vpop.f32.mrb[46].mxu0  ;;  %v4348_v50 = vadd.f32 %v1503_v15, %v4300_v26  ;;  %v1908_v56 = vsel %vm1652_vm0, %v1305_v63, %v1780_v46  ;;  %v1778_v17 = vmul.f32 0.2, %v1494_v41  ;;  %v1313_v33 = vadd.f32 %v1312_v31, %v4304_v53 }
 0x20f   :  { %v1905_v52 = vsel %vm1649_vm3, %v1303_v12, %v1777_v18  ;;  %v1907_v57 = vsel %vm1651_vm4, %v1496_v23, %v1779_v16  ;;  %v1782_v27 = vmul.f32 0.2, %v1498_v22  ;;  %v1316_v58 = vpop.f32.mrb[47].mxu1  ;;  %v1509_v40 = vpop.f32.mrb[47].mxu0  ;;  %v1904_v59 = vsel %vm1648_vm5, %v1301_v29, %v1776_v54 }
 0x210   :  { %v2025_v44 = vpack.c.bf16 %v1909_v45, %v1905_v52  ;;  %v2027_v7 = vpack.c.bf16 %v1911_v47, %v1907_v57  ;;  %vm1654_vm7 = vcmp.gt.f32.partialorder %v1498_v22, 0.0  ;;  %v1317_v8 = vadd.f32 %v1316_v58, %v4304_v53 }
 0x211   :  { %v1510_v0 = vadd.f32 %v1509_v40, %v4306_v39  ;;  %v2024_v49 = vpack.c.bf16 %v1908_v56, %v1904_v59  ;;  %vm1656_vm8 = vcmp.gt.f32.partialorder %v4345_v30, 0.0  ;;  %v1784_v1 = vmul.f32 0.2, %v4345_v30 }
 0x212   :  { %vm1658_vm9 = vcmp.gt.f32.partialorder %v4348_v50, 0.0  ;;  %v1506_v36 = vadd.f32 %v1505_v14, %v4306_v39  ;;  %2391 = vmatprep.mubr.bf16.mxu1 %v2025_v44  ;;  %2552 = vmatprep.mubr.bf16.mxu0 %v2027_v7  ;;  %v1785_v51 = vmul.f32 0.2, %v1313_v33  ;;  %v1315_v55 = vadd.f32 %v1314_v48, %v4298_v28 }
 0x213   :  { %vm1661_vm10 = vcmp.gt.f32.partialorder %v1317_v8, 0.0  ;;  %v1789_v3 = vmul.f32 0.2, %v1317_v8  ;;  %2392 = vmatmul.mubr.bf16.gmra.mrb[104].mxu1 %v2024_v49  ;;  %vm1657_vm11 = vcmp.gt.f32.partialorder %v1313_v33, 0.0  ;;  %v1508_v6 = vadd.f32 %v1507_v13, %v4300_v26 }
 0x214   :  { %v1320_v20 = vpop.f32.mrb[48].mxu1  ;;  %v1513_v42 = vpop.f32.mrb[48].mxu0  ;;  %v1906_v10 = vsel %vm1650_vm6, %v1494_v41, %v1778_v17  ;;  %v1910_v4 = vsel %vm1654_vm7, %v1498_v22, %v1782_v27  ;;  %v1791_v2 = vmul.f32 0.2, %v1510_v0  ;;  %v1786_v21 = vmul.f32 0.2, %v4348_v50 }
 0x215   :  { %v1322_v11 = vpop.f32.mrb[49].mxu1  ;;  %v1515_v12 = vpop.f32.mrb[49].mxu0  ;;  %v2026_v5 = vpack.c.bf16 %v1910_v4, %v1906_v10  ;;  %v4366_v19 = vadd.f32 %v1320_v20, %v4298_v28  ;;  %v1917_v23 = vsel %vm1661_vm10, %v1317_v8, %v1789_v3  ;;  %vm1663_vm12 = vcmp.gt.f32.partialorder %v1510_v0, 0.0 }
 0x216   :  { %v1324_v43 = vpop.f32.mrb[50].mxu1  ;;  %v1517_v61 = vpop.f32.mrb[50].mxu0  ;;  %v4370_v24 = vadd.f32 %v1513_v42, %v4300_v26  ;;  %v4373_v29 = vadd.f32 %v1322_v11, %v4304_v53  ;;  %vm1659_vm13 = vcmp.gt.f32.partialorder %v1506_v36, 0.0  ;;  %v1787_v63 = vmul.f32 0.2, %v1506_v36 }
 0x217   :  { %v1788_v32 = vmul.f32 0.2, %v1315_v55  ;;  %2553 = vmatmul.mubr.bf16.gmra.mrb[104].mxu0 %v2026_v5  ;;  %v1913_v34 = vsel %vm1657_vm11, %v1313_v33, %v1785_v51  ;;  %vm1660_vm14 = vcmp.gt.f32.partialorder %v1315_v55, 0.0  ;;  %vm1662_vm15 = vcmp.gt.f32.partialorder %v1508_v6, 0.0  ;;  %v1326_v37 = vpop.f32.mrb[51].mxu1  ;;  %v1519_v18 = vpop.f32.mrb[51].mxu0 }
 0x218   :  { %v1790_v35 = vmul.f32 0.2, %v1508_v6  ;;  %v2029_v38 = vpack.c.bf16 %v1917_v23, %v1913_v34  ;;  %vm1664_vm0 = vcmp.gt.f32.partialorder %v4366_v19, 0.0  ;;  %v4378_v62 = vmul.f32 0.2, %v4366_v19 }
 0x219   :  { %v1516_v25 = vadd.f32 %v1515_v12, %v4306_v39  ;;  %v1919_v15 = vsel %vm1663_vm12, %v1510_v0, %v1791_v2  ;;  %vm1666_vm1 = vcmp.gt.f32.partialorder %v4370_v24, 0.0  ;;  %v1794_v46 = vmul.f32 0.2, %v4370_v24 }
 0x21a   :  { %vm1665_vm2 = vcmp.gt.f32.partialorder %v4373_v29, 0.0  ;;  %v1325_v60 = vadd.f32 %v1324_v43, %v4298_v28  ;;  %v1327_v9 = vadd.f32 %v1326_v37, %v4304_v53  ;;  %2399 = vmatprep.mubr.bf16.mxu1 %v2029_v38  ;;  %v1518_v54 = vadd.f32 %v1517_v61, %v4300_v26 }
 0x21b   :  { %v1520_v22 = vadd.f32 %v1519_v18, %v4306_v39  ;;  %v1915_v31 = vsel %vm1659_vm13, %v1506_v36, %v1787_v63  ;;  %v1912_v14 = vsel %vm1656_vm8, %v4345_v30, %v1784_v1  ;;  %v1916_v13 = vsel %vm1660_vm14, %v1315_v55, %v1788_v32 }
 0x21c   :  { %v1330_v41 = vpop.f32.mrb[52].mxu1  ;;  %v1523_v16 = vpop.f32.mrb[52].mxu0  ;;  %v2031_v48 = vpack.c.bf16 %v1919_v15, %v1915_v31  ;;  %v1914_v45 = vsel %vm1658_vm9, %v4348_v50, %v1786_v21  ;;  %v1918_v47 = vsel %vm1662_vm15, %v1508_v6, %v1790_v35  ;;  %v1793_v33 = vmul.f32 0.2, %v4373_v29 }
 0x21d   :  { %v1332_v56 = vpop.f32.mrb[53].mxu1  ;;  %v1525_v17 = vpop.f32.mrb[53].mxu0  ;;  %vm1667_vm3 = vcmp.gt.f32.partialorder %v1516_v25, 0.0  ;;  %v2028_v52 = vpack.c.bf16 %v1916_v13, %v1912_v14  ;;  %v2030_v57 = vpack.c.bf16 %v1918_v47, %v1914_v45  ;;  %v1795_v40 = vmul.f32 0.2, %v1516_v25 }
 0x21e   :  { %v1334_v27 = vpop.f32.mrb[54].mxu1  ;;  %v1527_v58 = vpop.f32.mrb[54].mxu0  ;;  %v1797_v30 = vmul.f32 0.2, %v1327_v9  ;;  %2560 = vmatprep.mubr.bf16.mxu0 %v2031_v48  ;;  %v4400_v44 = vadd.f32 %v1330_v41, %v4298_v28  ;;  %vm1668_vm4 = vcmp.gt.f32.partialorder %v1325_v60, 0.0  ;;  %vm1669_vm5 = vcmp.gt.f32.partialorder %v1327_v9, 0.0 }
 0x21f   :  { %v1336_v7 = vpop.f32.mrb[55].mxu1  ;;  %v1529_v59 = vpop.f32.mrb[55].mxu0  ;;  %v1799_v50 = vmul.f32 0.2, %v1520_v22  ;;  %2400 = vmatmul.mubr.bf16.gmra.mrb[108].mxu1 %v2028_v52  ;;  %2561 = vmatmul.mubr.bf16.gmra.mrb[108].mxu0 %v2030_v57  ;;  %v4403_v8 = vadd.f32 %v1523_v16, %v4300_v26  ;;  %v1796_v0 = vmul.f32 0.2, %v1325_v60  ;;  %v1333_v20 = vadd.f32 %v1332_v56, %v4304_v53 }
 0x220   :  { %vm1670_vm6 = vcmp.gt.f32.partialorder %v1518_v54, 0.0  ;;  %v1798_v49 = vmul.f32 0.2, %v1518_v54  ;;  %vm1671_vm7 = vcmp.gt.f32.partialorder %v1520_v22, 0.0  ;;  %v4407_v42 = vadd.f32 %v1525_v17, %v4306_v39 }
 0x221   :  { %v4410_v1 = vadd.f32 %v1334_v27, %v4298_v28  ;;  %v4413_v36 = vadd.f32 %v1527_v58, %v4300_v26  ;;  %vm1672_vm8 = vcmp.gt.f32.partialorder %v4400_v44, 0.0  ;;  %v4417_v51 = vmul.f32 0.2, %v4400_v44 }
 0x222   :  { %v1921_v55 = vsel %vm1665_vm2, %v4373_v29, %v1793_v33  ;;  %v1925_v3 = vsel %vm1669_vm5, %v1327_v9, %v1797_v30  ;;  %vm1674_vm9 = vcmp.gt.f32.partialorder %v4403_v8, 0.0  ;;  %v1337_v4 = vadd.f32 %v1336_v7, %v4304_v53 }
 0x223   :  { %v2033_v11 = vpack.c.bf16 %v1925_v3, %v1921_v55  ;;  %v1927_v12 = vsel %vm1671_vm7, %v1520_v22, %v1799_v50  ;;  %v1802_v43 = vmul.f32 0.2, %v4403_v8  ;;  %v1530_v61 = vadd.f32 %v1529_v59, %v4306_v39 }
 0x224   :  { %v1340_v6 = vpop.f32.mrb[56].mxu1  ;;  %v1533_v10 = vpop.f32.mrb[56].mxu0  ;;  %v1923_v23 = vsel %vm1667_vm3, %v1516_v25, %v1795_v40  ;;  %v1920_v21 = vsel %vm1664_vm0, %v4366_v19, %v4378_v62  ;;  %v1924_v63 = vsel %vm1668_vm4, %v1325_v60, %v1796_v0  ;;  %v1922_v32 = vsel %vm1666_vm1, %v4370_v24, %v1794_v46 }
 0x225   :  { %v1342_v2 = vpop.f32.mrb[57].mxu1  ;;  %v1535_v5 = vpop.f32.mrb[57].mxu0  ;;  %2407 = vmatprep.mubr.bf16.mxu1 %v2033_v11  ;;  %v2035_v29 = vpack.c.bf16 %v1927_v12, %v1923_v23  ;;  %v1926_v34 = vsel %vm1670_vm6, %v1518_v54, %v1798_v49  ;;  %vm1673_vm10 = vcmp.gt.f32.partialorder %v1333_v20, 0.0  ;;  %v1801_v18 = vmul.f32 0.2, %v1333_v20 }
 0x226   :  { %v1344_v35 = vpop.f32.mrb[58].mxu1  ;;  %v1537_v37 = vpop.f32.mrb[58].mxu0  ;;  %v2032_v38 = vpack.c.bf16 %v1924_v63, %v1920_v21  ;;  %v2034_v25 = vpack.c.bf16 %v1926_v34, %v1922_v32  ;;  %vm1675_vm11 = vcmp.gt.f32.partialorder %v4407_v42, 0.0  ;;  %v1803_v19 = vmul.f32 0.2, %v4407_v42 }
 0x227   :  { %v1346_v15 = vpop.f32.mrb[59].mxu1  ;;  %v1539_v41 = vpop.f32.mrb[59].mxu0  ;;  %v1805_v62 = vmul.f32 0.2, %v1337_v4  ;;  %2568 = vmatprep.mubr.bf16.mxu0 %v2035_v29  ;;  %v4440_v16 = vadd.f32 %v1340_v6, %v4298_v28  ;;  %vm1676_vm12 = vcmp.gt.f32.partialorder %v4410_v1, 0.0  ;;  %vm1677_vm13 = vcmp.gt.f32.partialorder %v1337_v4, 0.0 }
 0x228   :  { %v1807_v24 = vmul.f32 0.2, %v1530_v61  ;;  %2408 = vmatmul.mubr.bf16.gmra.mrb[112].mxu1 %v2032_v38  ;;  %2569 = vmatmul.mubr.bf16.gmra.mrb[112].mxu0 %v2034_v25  ;;  %v4444_v46 = vadd.f32 %v1533_v10, %v4300_v26  ;;  %v1804_v60 = vmul.f32 0.2, %v4410_v1  ;;  %vm1678_vm14 = vcmp.gt.f32.partialorder %v4413_v36, 0.0 }
 0x229   :  { %v1806_v9 = vmul.f32 0.2, %v4413_v36  ;;  %vm1679_vm15 = vcmp.gt.f32.partialorder %v1530_v61, 0.0  ;;  %v1343_v54 = vadd.f32 %v1342_v2, %v4304_v53  ;;  %v4451_v22 = vadd.f32 %v1535_v5, %v4306_v39 }
 0x22a   :  { %v4454_v31 = vadd.f32 %v1344_v35, %v4298_v28  ;;  %v4457_v14 = vadd.f32 %v1537_v37, %v4300_v26  ;;  %vm1680_vm0 = vcmp.gt.f32.partialorder %v4440_v16, 0.0  ;;  %v4461_v48 = vmul.f32 0.2, %v4440_v16 }
 0x22b   :  { %v1929_v13 = vsel %vm1673_vm10, %v1333_v20, %v1801_v18  ;;  %v1933_v45 = vsel %vm1677_vm13, %v1337_v4, %v1805_v62  ;;  %vm1682_vm1 = vcmp.gt.f32.partialorder %v4444_v46, 0.0  ;;  %v1347_v17 = vadd.f32 %v1346_v15, %v4304_v53 }
 0x22c   :  { %v1350_v47 = vpop.f32.mrb[60].mxu1  ;;  %v1543_v56 = vpop.f32.mrb[60].mxu0  ;;  %v2037_v33 = vpack.c.bf16 %v1933_v45, %v1929_v13  ;;  %v1935_v52 = vsel %vm1679_vm15, %v1530_v61, %v1807_v24  ;;  %v1810_v58 = vmul.f32 0.2, %v4444_v46  ;;  %v1540_v40 = vadd.f32 %v1539_v41, %v4306_v39 }
 0x22d   :  { %v1352_v57 = vpop.f32.mrb[61].mxu1  ;;  %v1545_v27 = vpop.f32.mrb[61].mxu0  ;;  %v1931_v30 = vsel %vm1675_vm11, %v4407_v42, %v1803_v19  ;;  %v1928_v7 = vsel %vm1672_vm8, %v4400_v44, %v4417_v51  ;;  %v1932_v50 = vsel %vm1676_vm12, %v4410_v1, %v1804_v60  ;;  %v1930_v0 = vsel %vm1674_vm9, %v4403_v8, %v1802_v43 }
 0x22e   :  { %2415 = vmatprep.mubr.bf16.mxu1 %v2037_v33  ;;  %v2039_v59 = vpack.c.bf16 %v1935_v52, %v1931_v30  ;;  %v1934_v49 = vsel %vm1678_vm14, %v4413_v36, %v1806_v9  ;;  %v1354_v20 = vpop.f32.mrb[62].mxu1  ;;  %v1547_v42 = vpop.f32.mrb[62].mxu0  ;;  %vm1681_vm2 = vcmp.gt.f32.partialorder %v1343_v54, 0.0  ;;  %v1809_v55 = vmul.f32 0.2, %v1343_v54 }
 0x22f   :  { %v2036_v3 = vpack.c.bf16 %v1932_v50, %v1928_v7  ;;  %v2038_v44 = vpack.c.bf16 %v1934_v49, %v1930_v0  ;;  %v1356_v51 = vpop.f32.mrb[63].mxu1  ;;  %v1549_v6 = vpop.f32.mrb[63].mxu0  ;;  %vm1683_vm3 = vcmp.gt.f32.partialorder %v4451_v22, 0.0  ;;  %v1811_v1 = vmul.f32 0.2, %v4451_v22 }
 0x230   :  { %v1813_v10 = vmul.f32 0.2, %v1347_v17  ;;  %2576 = vmatprep.mubr.bf16.mxu0 %v2039_v59  ;;  %v4488_v8 = vadd.f32 %v1350_v47, %v4298_v28  ;;  %vm1684_vm4 = vcmp.gt.f32.partialorder %v4454_v31, 0.0  ;;  %vm1685_vm5 = vcmp.gt.f32.partialorder %v1347_v17, 0.0 }
 0x231   :  { %v1815_v36 = vmul.f32 0.2, %v1540_v40  ;;  %2416 = vmatmul.mubr.bf16.gmra.mrb[116].mxu1 %v2036_v3  ;;  %2577 = vmatmul.mubr.bf16.gmra.mrb[116].mxu0 %v2038_v44  ;;  %v4492_v4 = vadd.f32 %v1543_v56, %v4300_v26  ;;  %v1812_v11 = vmul.f32 0.2, %v4454_v31  ;;  %vm1686_vm6 = vcmp.gt.f32.partialorder %v4457_v14, 0.0 }
 0x232   :  { %vm1687_vm7 = vcmp.gt.f32.partialorder %v1540_v40, 0.0  ;;  %v1353_v12 = vadd.f32 %v1352_v57, %v4304_v53  ;;  %v1814_v2 = vmul.f32 0.2, %v4457_v14  ;;  %v4499_v5 = vadd.f32 %v1545_v27, %v4306_v39 }
 0x233   :  { %v4502_v43 = vadd.f32 %v1354_v20, %v4298_v28  ;;  %v4505_v61 = vadd.f32 %v1547_v42, %v4300_v26  ;;  %vm1688_vm8 = vcmp.gt.f32.partialorder %v4488_v8, 0.0  ;;  %v4509_v23 = vmul.f32 0.2, %v4488_v8 }
 0x234   :  { %v1937_v21 = vsel %vm1681_vm2, %v1343_v54, %v1809_v55  ;;  %v1941_v29 = vsel %vm1685_vm5, %v1347_v17, %v1813_v10  ;;  %v1360_v63 = vpop.f32.mrb[64].mxu1  ;;  %v1553_v32 = vpop.f32.mrb[64].mxu0  ;;  %vm1690_vm9 = vcmp.gt.f32.partialorder %v4492_v4, 0.0  ;;  %v4515_v34 = vmul.f32 0.2, %v4492_v4 }
 0x235   :  { %v1357_v35 = vadd.f32 %v1356_v51, %v4304_v53  ;;  %v2041_v37 = vpack.c.bf16 %v1941_v29, %v1937_v21  ;;  %v1943_v18 = vsel %vm1687_vm7, %v1540_v40, %v1815_v36  ;;  %v1362_v38 = vpop.f32.mrb[65].mxu1  ;;  %v1555_v25 = vpop.f32.mrb[65].mxu0  ;;  %vm1689_vm10 = vcmp.gt.f32.partialorder %v1353_v12, 0.0 }
 0x236   :  { %v1550_v15 = vadd.f32 %v1549_v6, %v4306_v39  ;;  %v1939_v41 = vsel %vm1683_vm3, %v4451_v22, %v1811_v1  ;;  %v1936_v19 = vsel %vm1680_vm0, %v4440_v16, %v4461_v48  ;;  %v1940_v24 = vsel %vm1684_vm4, %v4454_v31, %v1812_v11  ;;  %v1364_v54 = vpop.f32.mrb[66].mxu1  ;;  %v1557_v22 = vpop.f32.mrb[66].mxu0 }
 0x237   :  { %2423 = vmatprep.mubr.bf16.mxu1 %v2041_v37  ;;  %v2043_v62 = vpack.c.bf16 %v1943_v18, %v1939_v41  ;;  %v1938_v60 = vsel %vm1682_vm1, %v4444_v46, %v1810_v58  ;;  %v1942_v9 = vsel %vm1686_vm6, %v4457_v14, %v1814_v2  ;;  %v1817_v13 = vmul.f32 0.2, %v1353_v12  ;;  %v1366_v45 = vpop.f32.mrb[67].mxu1  ;;  %v1559_v47 = vpop.f32.mrb[67].mxu0 }
 0x238   :  { %vm1691_vm11 = vcmp.gt.f32.partialorder %v4499_v5, 0.0  ;;  %v2040_v16 = vpack.c.bf16 %v1940_v24, %v1936_v19  ;;  %v2042_v48 = vpack.c.bf16 %v1942_v9, %v1938_v60  ;;  %v1819_v56 = vmul.f32 0.2, %v4499_v5 }
 0x239   :  { %v1821_v31 = vmul.f32 0.2, %v1357_v35  ;;  %2584 = vmatprep.mubr.bf16.mxu0 %v2043_v62  ;;  %v4539_v17 = vadd.f32 %v1360_v63, %v4298_v28  ;;  %vm1692_vm12 = vcmp.gt.f32.partialorder %v4502_v43, 0.0  ;;  %vm1693_vm13 = vcmp.gt.f32.partialorder %v1357_v35, 0.0 }
 0x23a   :  { %v1823_v14 = vmul.f32 0.2, %v1550_v15  ;;  %2424 = vmatmul.mubr.bf16.gmra.mrb[120].mxu1 %v2040_v16  ;;  %2585 = vmatmul.mubr.bf16.gmra.mrb[120].mxu0 %v2042_v48  ;;  %v4543_v52 = vadd.f32 %v1553_v32, %v4300_v26  ;;  %v1820_v57 = vmul.f32 0.2, %v4502_v43  ;;  %vm1694_vm14 = vcmp.gt.f32.partialorder %v4505_v61, 0.0 }
 0x23b   :  { %vm1695_vm15 = vcmp.gt.f32.partialorder %v1550_v15, 0.0  ;;  %v1363_v27 = vadd.f32 %v1362_v38, %v4304_v53  ;;  %v1822_v58 = vmul.f32 0.2, %v4505_v61  ;;  %v4550_v40 = vadd.f32 %v1555_v25, %v4306_v39 }
 0x23c   :  { %v1370_v46 = vpop.f32.mrb[68].mxu1  ;;  %v1563_v33 = vpop.f32.mrb[68].mxu0  ;;  %v4553_v30 = vadd.f32 %v1364_v54, %v4298_v28  ;;  %v4556_v7 = vadd.f32 %v1557_v22, %v4300_v26  ;;  %vm1696_vm0 = vcmp.gt.f32.partialorder %v4539_v17, 0.0  ;;  %v4560_v59 = vmul.f32 0.2, %v4539_v17 }
 0x23d   :  { %v1945_v50 = vsel %vm1689_vm10, %v1353_v12, %v1817_v13  ;;  %v1949_v0 = vsel %vm1693_vm13, %v1357_v35, %v1821_v31  ;;  %v1372_v49 = vpop.f32.mrb[69].mxu1  ;;  %v1565_v20 = vpop.f32.mrb[69].mxu0  ;;  %vm1698_vm1 = vcmp.gt.f32.partialorder %v4543_v52, 0.0  ;;  %v4566_v42 = vmul.f32 0.2, %v4543_v52 }
 0x23e   :  { %v1367_v55 = vadd.f32 %v1366_v45, %v4304_v53  ;;  %v2045_v3 = vpack.c.bf16 %v1949_v0, %v1945_v50  ;;  %v1951_v44 = vsel %vm1695_vm15, %v1550_v15, %v1823_v14  ;;  %v1374_v51 = vpop.f32.mrb[70].mxu1  ;;  %v1567_v6 = vpop.f32.mrb[70].mxu0  ;;  %vm1697_vm2 = vcmp.gt.f32.partialorder %v1363_v27, 0.0 }
 0x23f   :  { %v1560_v1 = vadd.f32 %v1559_v47, %v4306_v39  ;;  %v1947_v10 = vsel %vm1691_vm11, %v4499_v5, %v1819_v56  ;;  %v1944_v36 = vsel %vm1688_vm8, %v4488_v8, %v4509_v23  ;;  %v1948_v12 = vsel %vm1692_vm12, %v4502_v43, %v1820_v57  ;;  %v1376_v21 = vpop.f32.mrb[71].mxu1  ;;  %v1569_v29 = vpop.f32.mrb[71].mxu0 }
 0x240   :  { %2431 = vmatprep.mubr.bf16.mxu1 %v2045_v3  ;;  %v2047_v11 = vpack.c.bf16 %v1951_v44, %v1947_v10  ;;  %v1946_v2 = vsel %vm1690_vm9, %v4492_v4, %v4515_v34  ;;  %v1950_v5 = vsel %vm1694_vm14, %v4505_v61, %v1822_v58  ;;  %v1825_v63 = vmul.f32 0.2, %v1363_v27 }
 0x241   :  { %vm1699_vm3 = vcmp.gt.f32.partialorder %v4550_v40, 0.0  ;;  %v2044_v8 = vpack.c.bf16 %v1948_v12, %v1944_v36  ;;  %v2046_v23 = vpack.c.bf16 %v1950_v5, %v1946_v2  ;;  %v1827_v43 = vmul.f32 0.2, %v4550_v40 }
 0x242   :  { %v1829_v37 = vmul.f32 0.2, %v1367_v55  ;;  %2592 = vmatprep.mubr.bf16.mxu0 %v2047_v11  ;;  %v4591_v18 = vadd.f32 %v1370_v46, %v4298_v28  ;;  %vm1700_vm4 = vcmp.gt.f32.partialorder %v4553_v30, 0.0  ;;  %vm1701_vm5 = vcmp.gt.f32.partialorder %v1367_v55, 0.0 }
 0x243   :  { %v1831_v61 = vmul.f32 0.2, %v1560_v1  ;;  %2432 = vmatmul.mubr.bf16.gmra.mrb[124].mxu1 %v2044_v8  ;;  %2593 = vmatmul.mubr.bf16.gmra.mrb[124].mxu0 %v2046_v23  ;;  %v4595_v38 = vadd.f32 %v1563_v33, %v4300_v26  ;;  %v1828_v25 = vmul.f32 0.2, %v4553_v30  ;;  %vm1702_vm6 = vcmp.gt.f32.partialorder %v4556_v7, 0.0 }
 0x244   :  { %v1380_v32 = vpop.f32.mrb[72].mxu1  ;;  %v1573_v35 = vpop.f32.mrb[72].mxu0  ;;  %vm1703_vm7 = vcmp.gt.f32.partialorder %v1560_v1, 0.0  ;;  %v1373_v15 = vadd.f32 %v1372_v49, %v4304_v53  ;;  %v1830_v41 = vmul.f32 0.2, %v4556_v7  ;;  %v4602_v19 = vadd.f32 %v1565_v20, %v4306_v39 }
 0x245   :  { %v1382_v4 = vpop.f32.mrb[73].mxu1  ;;  %v1575_v34 = vpop.f32.mrb[73].mxu0  ;;  %v4605_v62 = vadd.f32 %v1374_v51, %v4298_v28  ;;  %v4608_v24 = vadd.f32 %v1567_v6, %v4300_v26  ;;  %vm1704_vm8 = vcmp.gt.f32.partialorder %v4591_v18, 0.0  ;;  %v4612_v60 = vmul.f32 0.2, %v4591_v18 }
 0x246   :  { %v1953_v9 = vsel %vm1697_vm2, %v1363_v27, %v1825_v63  ;;  %v1957_v54 = vsel %vm1701_vm5, %v1367_v55, %v1829_v37  ;;  %v1384_v22 = vpop.f32.mrb[74].mxu1  ;;  %v1577_v13 = vpop.f32.mrb[74].mxu0  ;;  %vm1706_vm9 = vcmp.gt.f32.partialorder %v4595_v38, 0.0  ;;  %v1834_v16 = vmul.f32 0.2, %v4595_v38 }
 0x247   :  { %v1377_v48 = vadd.f32 %v1376_v21, %v4304_v53  ;;  %v2049_v45 = vpack.c.bf16 %v1957_v54, %v1953_v9  ;;  %v1959_v47 = vsel %vm1703_vm7, %v1560_v1, %v1831_v61  ;;  %v1386_v56 = vpop.f32.mrb[75].mxu1  ;;  %v1579_v31 = vpop.f32.mrb[75].mxu0  ;;  %vm1705_vm10 = vcmp.gt.f32.partialorder %v1373_v15, 0.0 }
 0x248   :  { %v1570_v46 = vadd.f32 %v1569_v29, %v4306_v39  ;;  %v1955_v33 = vsel %vm1699_vm3, %v4550_v40, %v1827_v43  ;;  %v1952_v14 = vsel %vm1696_vm0, %v4539_v17, %v4560_v59  ;;  %v1956_v27 = vsel %vm1700_vm4, %v4553_v30, %v1828_v25 }
 0x249   :  { %2439 = vmatprep.mubr.bf16.mxu1 %v2049_v45  ;;  %v2051_v57 = vpack.c.bf16 %v1959_v47, %v1955_v33  ;;  %v1954_v58 = vsel %vm1698_vm1, %v4543_v52, %v4566_v42  ;;  %v1958_v40 = vsel %vm1702_vm6, %v4556_v7, %v1830_v41  ;;  %v1833_v49 = vmul.f32 0.2, %v1373_v15 }
 0x24a   :  { %vm1707_vm11 = vcmp.gt.f32.partialorder %v4602_v19, 0.0  ;;  %v2048_v17 = vpack.c.bf16 %v1956_v27, %v1952_v14  ;;  %v2050_v59 = vpack.c.bf16 %v1958_v40, %v1954_v58  ;;  %v1835_v30 = vmul.f32 0.2, %v4602_v19 }
 0x24b   :  { %v1837_v3 = vmul.f32 0.2, %v1377_v48  ;;  %2600 = vmatprep.mubr.bf16.mxu0 %v2051_v57  ;;  %v4643_v52 = vadd.f32 %v1380_v32, %v4298_v28  ;;  %vm1708_vm12 = vcmp.gt.f32.partialorder %v4605_v62, 0.0  ;;  %vm1709_vm13 = vcmp.gt.f32.partialorder %v1377_v48, 0.0 }
 0x24c   :  { %v1390_v50 = vpop.f32.mrb[76].mxu1  ;;  %v1583_v0 = vpop.f32.mrb[76].mxu0  ;;  %v1839_v44 = vmul.f32 0.2, %v1570_v46  ;;  %2440 = vmatmul.mubr.bf16.gmra.mrb[128].mxu1 %v2048_v17  ;;  %2601 = vmatmul.mubr.bf16.gmra.mrb[128].mxu0 %v2050_v59  ;;  %v4651_v51 = vadd.f32 %v1573_v35, %v4300_v26  ;;  %v1836_v6 = vmul.f32 0.2, %v4605_v62  ;;  %v1383_v1 = vadd.f32 %v1382_v4, %v4304_v53 }
 0x24d   :  { %v1392_v20 = vpop.f32.mrb[77].mxu1  ;;  %v4639_v55 = vpop.f32.mrb[77].mxu0  ;;  %vm1710_vm14 = vcmp.gt.f32.partialorder %v4608_v24, 0.0  ;;  %vm1711_vm15 = vcmp.gt.f32.partialorder %v1570_v46, 0.0  ;;  %v1838_v10 = vmul.f32 0.2, %v4608_v24  ;;  %v4658_v36 = vadd.f32 %v1575_v34, %v4306_v39 }
 0x24e   :  { %v4645_v42 = vpop.f32.mrb[78].mxu1  ;;  %v4647_v7 = vpop.f32.mrb[78].mxu0  ;;  %v4661_v11 = vadd.f32 %v1384_v22, %v4298_v28  ;;  %v4664_v12 = vadd.f32 %v1577_v13, %v4300_v26  ;;  %vm1712_vm0 = vcmp.gt.f32.partialorder %v4643_v52, 0.0  ;;  %v4668_v2 = vmul.f32 0.2, %v4643_v52 }
 0x24f   :  { %v1961_v5 = vsel %vm1705_vm10, %v1373_v15, %v1833_v49  ;;  %v1965_v21 = vsel %vm1709_vm13, %v1377_v48, %v1837_v3  ;;  %v1396_v29 = vpop.f32.mrb[79].mxu1  ;;  %v1589_v63 = vpop.f32.mrb[79].mxu0  ;;  %vm1714_vm1 = vcmp.gt.f32.partialorder %v4651_v51, 0.0  ;;  %v4674_v8 = vmul.f32 0.2, %v4651_v51 }
 0x250   :  { %v1387_v23 = vadd.f32 %v1386_v56, %v4304_v53  ;;  %v2053_v32 = vpack.c.bf16 %v1965_v21, %v1961_v5  ;;  %v1967_v35 = vsel %vm1711_vm15, %v1570_v46, %v1839_v44  ;;  %vm1713_vm2 = vcmp.gt.f32.partialorder %v1383_v1, 0.0 }
 0x251   :  { %v1580_v43 = vadd.f32 %v1579_v31, %v4306_v39  ;;  %v1963_v37 = vsel %vm1707_vm11, %v4602_v19, %v1835_v30  ;;  %v1960_v4 = vsel %vm1704_vm8, %v4591_v18, %v4612_v60  ;;  %v1964_v61 = vsel %vm1708_vm12, %v4605_v62, %v1836_v6 }
 0x252   :  { %2447 = vmatprep.mubr.bf16.mxu1 %v2053_v32  ;;  %v2055_v34 = vpack.c.bf16 %v1967_v35, %v1963_v37  ;;  %v1962_v25 = vsel %vm1706_vm9, %v4595_v38, %v1834_v16  ;;  %v1966_v15 = vsel %vm1710_vm14, %v4608_v24, %v1838_v10  ;;  %v1841_v9 = vmul.f32 0.2, %v1383_v1 }
 0x253   :  { %v2052_v54 = vpack.c.bf16 %v1964_v61, %v1960_v4  ;;  %v2054_v22 = vpack.c.bf16 %v1966_v15, %v1962_v25  ;;  %v4696_v18 = vadd.f32 %v1390_v50, %v4298_v28  ;;  %vm1715_vm3 = vcmp.gt.f32.partialorder %v4658_v36, 0.0 }
 0x254   :  { %v1400_v41 = vpop.f32.mrb[80].mxu1  ;;  %v1593_v19 = vpop.f32.mrb[80].mxu0  ;;  %v1845_v62 = vmul.f32 0.2, %v1387_v23  ;;  %2608 = vmatprep.mubr.bf16.mxu0 %v2055_v34  ;;  %v4700_v38 = vadd.f32 %v1583_v0, %v4300_v26  ;;  %v4703_v16 = vadd.f32 %v1392_v20, %v4304_v53  ;;  %v1843_v45 = vmul.f32 0.2, %v4658_v36 }
 0x255   :  { %v1402_v60 = vpop.f32.mrb[81].mxu1  ;;  %v1595_v13 = vpop.f32.mrb[81].mxu0  ;;  %vm1716_vm4 = vcmp.gt.f32.partialorder %v4661_v11, 0.0  ;;  %vm1717_vm5 = vcmp.gt.f32.partialorder %v1387_v23, 0.0  ;;  %v1847_v47 = vmul.f32 0.2, %v1580_v43  ;;  %2448 = vmatmul.mubr.bf16.gmra.mrb[132].mxu1 %v2052_v54  ;;  %2609 = vmatmul.mubr.bf16.gmra.mrb[132].mxu0 %v2054_v22  ;;  %v4715_v31 = vadd.f32 %v4639_v55, %v4306_v39 }
 0x256   :  { %v4705_v24 = vpop.f32.mrb[82].mxu1  ;;  %v4707_v48 = vpop.f32.mrb[82].mxu0  ;;  %v1844_v56 = vmul.f32 0.2, %v4661_v11  ;;  %vm1718_vm6 = vcmp.gt.f32.partialorder %v4664_v12, 0.0  ;;  %vm1719_vm7 = vcmp.gt.f32.partialorder %v1580_v43, 0.0  ;;  %v4723_v14 = vadd.f32 %v4645_v42, %v4298_v28 }
 0x257   :  { %v1846_v46 = vmul.f32 0.2, %v4664_v12  ;;  %v4719_v33 = vmul.f32 0.2, %v4696_v18  ;;  %v4727_v57 = vadd.f32 %v4647_v7, %v4300_v26  ;;  %vm1720_vm8 = vcmp.gt.f32.partialorder %v4696_v18, 0.0  ;;  %v1406_v50 = vpop.f32.mrb[83].mxu1 }
 0x258   :  { %v4731_v27 = vmul.f32 0.2, %v4700_v38  ;;  %vm1721_vm9 = vcmp.gt.f32.partialorder %v4703_v16, 0.0  ;;  %v1969_v58 = vsel %vm1713_vm2, %v1383_v1, %v1841_v9  ;;  %v1973_v40 = vsel %vm1717_vm5, %v1387_v23, %v1845_v62  ;;  %v1599_v0 = vpop.f32.mrb[83].mxu0 }
 0x259   :  { %vm1722_vm10 = vcmp.gt.f32.partialorder %v4700_v38, 0.0  ;;  %v1849_v49 = vmul.f32 0.2, %v4703_v16  ;;  %v1397_v17 = vadd.f32 %v1396_v29, %v4304_v53  ;;  %v2057_v59 = vpack.c.bf16 %v1973_v40, %v1969_v58 }
 0x25a   :  { %v1975_v20 = vsel %vm1719_vm7, %v1580_v43, %v1847_v47  ;;  %vm1723_vm11 = vcmp.gt.f32.partialorder %v4715_v31, 0.0  ;;  %v1590_v3 = vadd.f32 %v1589_v63, %v4306_v39  ;;  %v1971_v42 = vsel %vm1715_vm3, %v4658_v36, %v1843_v45 }
 0x25b   :  { %v1968_v7 = vsel %vm1712_vm0, %v4643_v52, %v4668_v2  ;;  %2455 = vmatprep.mubr.bf16.mxu1 %v2057_v59  ;;  %v2059_v44 = vpack.c.bf16 %v1975_v20, %v1971_v42  ;;  %v1972_v6 = vsel %vm1716_vm4, %v4661_v11, %v1844_v56  ;;  %v1970_v1 = vsel %vm1714_vm1, %v4651_v51, %v4674_v8 }
 0x25c   :  { %v4740_v55 = vpop.f32.mrb[84].mxu1  ;;  %v4742_v30 = vpop.f32.mrb[84].mxu0  ;;  %v1974_v10 = vsel %vm1718_vm6, %v4664_v12, %v1846_v46  ;;  %v2056_v52 = vpack.c.bf16 %v1972_v6, %v1968_v7  ;;  %v4768_v21 = vadd.f32 %v1400_v41, %v4298_v28  ;;  %v4771_v11 = vadd.f32 %v1593_v19, %v4300_v26 }
 0x25d   :  { %v4763_v36 = vpop.f32.mrb[85].mxu1  ;;  %v4765_v5 = vpop.f32.mrb[85].mxu0  ;;  %v2058_v2 = vpack.c.bf16 %v1974_v10, %v1970_v1  ;;  %v1851_v51 = vmul.f32 0.2, %v4715_v31  ;;  %v1853_v8 = vmul.f32 0.2, %v1397_v17  ;;  %2616 = vmatprep.mubr.bf16.mxu0 %v2059_v44  ;;  %v4779_v12 = vadd.f32 %v1402_v60, %v4304_v53 }
 0x25e   :  { %v4773_v29 = vpop.f32.mrb[86].mxu1  ;;  %v4775_v63 = vpop.f32.mrb[86].mxu0  ;;  %v4782_v23 = vadd.f32 %v1595_v13, %v4306_v39  ;;  %vm1724_vm12 = vcmp.gt.f32.partialorder %v4723_v14, 0.0  ;;  %v1852_v43 = vmul.f32 0.2, %v4723_v14  ;;  %vm1725_vm13 = vcmp.gt.f32.partialorder %v1397_v17, 0.0  ;;  %2456 = vmatmul.mubr.bf16.gmra.mrb[136].mxu1 %v2056_v52 }
 0x25f   :  { %v4784_v32 = vpop.f32.mrb[87].mxu1  ;;  %v4786_v35 = vpop.f32.mrb[87].mxu0  ;;  %v1855_v37 = vmul.f32 0.2, %v1590_v3  ;;  %2617 = vmatmul.mubr.bf16.gmra.mrb[136].mxu0 %v2058_v2  ;;  %vm1726_vm14 = vcmp.gt.f32.partialorder %v4727_v57, 0.0  ;;  %vm1727_vm15 = vcmp.gt.f32.partialorder %v1590_v3, 0.0  ;;  %v4794_v34 = vadd.f32 %v4705_v24, %v4298_v28 }
 0x260   :  { %v1854_v4 = vmul.f32 0.2, %v4727_v57  ;;  %v4797_v61 = vmul.f32 0.2, %v4768_v21  ;;  %v4800_v25 = vmul.f32 0.2, %v4771_v11  ;;  %v4805_v15 = vadd.f32 %v4707_v48, %v4300_v26 }
 0x261   :  { %vm1729_vm0 = vcmp.gt.f32.partialorder %v4779_v12, 0.0  ;;  %vm1728_vm1 = vcmp.gt.f32.partialorder %v4768_v21, 0.0  ;;  %v1857_v41 = vmul.f32 0.2, %v4779_v12  ;;  %vm1731_vm2 = vcmp.gt.f32.partialorder %v4782_v23, 0.0 }
 0x262   :  { %v1977_v19 = vsel %vm1721_vm9, %v4703_v16, %v1849_v49  ;;  %v1981_v9 = vsel %vm1725_vm13, %v1397_v17, %v1853_v8  ;;  %vm1730_vm3 = vcmp.gt.f32.partialorder %v4771_v11, 0.0  ;;  %v1859_v60 = vmul.f32 0.2, %v4782_v23 }
 0x263   :  { %v1407_v13 = vadd.f32 %v1406_v50, %v4304_v53  ;;  %v2061_v62 = vpack.c.bf16 %v1981_v9, %v1977_v19  ;;  %v1983_v24 = vsel %vm1727_vm15, %v1590_v3, %v1855_v37  ;;  %vm1732_vm4 = vcmp.gt.f32.partialorder %v4794_v34, 0.0 }
 0x264   :  { %v4814_v54 = vpop.f32.mrb[88].mxu1  ;;  %v4816_v22 = vpop.f32.mrb[88].mxu0  ;;  %v1600_v16 = vadd.f32 %v1599_v0, %v4306_v39  ;;  %v1979_v47 = vsel %vm1723_vm11, %v4715_v31, %v1851_v51  ;;  %v1976_v56 = vsel %vm1720_vm8, %v4696_v18, %v4719_v33  ;;  %v1980_v58 = vsel %vm1724_vm12, %v4723_v14, %v1852_v43 }
 0x265   :  { %v4822_v48 = vpop.f32.mrb[89].mxu1  ;;  %v4824_v45 = vpop.f32.mrb[89].mxu0  ;;  %2463 = vmatprep.mubr.bf16.mxu1 %v2061_v62  ;;  %v2063_v46 = vpack.c.bf16 %v1983_v24, %v1979_v47  ;;  %v1978_v40 = vsel %vm1722_vm10, %v4700_v38, %v4731_v27  ;;  %v1982_v31 = vsel %vm1726_vm14, %v4727_v57, %v1854_v4  ;;  %v2060_v49 = vpack.c.bf16 %v1980_v58, %v1976_v56 }
 0x266   :  { %v1424_v50 = vpop.f32.mrb[90].mxu1  ;;  %v1617_v0 = vpop.f32.mrb[90].mxu0  ;;  %v2062_v17 = vpack.c.bf16 %v1982_v31, %v1978_v40  ;;  %v4847_v18 = vadd.f32 %v4740_v55, %v4298_v28  ;;  %v4851_v33 = vadd.f32 %v4742_v30, %v4300_v26  ;;  %v1860_v38 = vmul.f32 0.2, %v4794_v34 }
 0x267   :  { %v4853_v14 = vpop.f32.mrb[91].mxu1  ;;  %v4855_v59 = vpop.f32.mrb[91].mxu0  ;;  %v1861_v27 = vmul.f32 0.2, %v1407_v13  ;;  %2624 = vmatprep.mubr.bf16.mxu0 %v2063_v46  ;;  %v4860_v57 = vadd.f32 %v4763_v36, %v4304_v53  ;;  %v4864_v20 = vadd.f32 %v4765_v5, %v4306_v39  ;;  %vm1733_vm5 = vcmp.gt.f32.partialorder %v1407_v13, 0.0  ;;  %2464 = vmatmul.mubr.bf16.gmra.mrb[140].mxu1 %v2060_v49 }
 0x268   :  { %v1863_v55 = vmul.f32 0.2, %v1600_v16  ;;  %2625 = vmatmul.mubr.bf16.gmra.mrb[140].mxu0 %v2062_v17  ;;  %v4868_v30 = vadd.f32 %v4773_v29, %v4298_v28  ;;  %v4872_v3 = vadd.f32 %v4775_v63, %v4300_v26  ;;  %vm1734_vm6 = vcmp.gt.f32.partialorder %v4805_v15, 0.0 }
 0x269   :  { %v1862_v42 = vmul.f32 0.2, %v4805_v15  ;;  %vm1735_vm7 = vcmp.gt.f32.partialorder %v1600_v16, 0.0  ;;  %v4877_v7 = vmul.f32 0.2, %v4847_v18  ;;  %vm1736_vm8 = vcmp.gt.f32.partialorder %v4847_v18, 0.0 }
 0x26a   :  { %v4881_v44 = vmul.f32 0.2, %v4851_v33  ;;  %vm1737_vm9 = vcmp.gt.f32.partialorder %v4860_v57, 0.0  ;;  %v1865_v6 = vmul.f32 0.2, %v4860_v57  ;;  %vm1739_vm10 = vcmp.gt.f32.partialorder %v4864_v20, 0.0 }
 0x26b   :  { %v1867_v1 = vmul.f32 0.2, %v4864_v20  ;;  %v1417_v10 = vadd.f32 %v4784_v32, %v4304_v53  ;;  %v1985_v36 = vsel %vm1729_vm0, %v4779_v12, %v1857_v41  ;;  %v1989_v5 = vsel %vm1733_vm5, %v1407_v13, %v1861_v27 }
 0x26c   :  { %v4893_v52 = vpop.f32.mrb[92].mxu1  ;;  %v4895_v2 = vpop.f32.mrb[92].mxu0  ;;  %vm1738_vm11 = vcmp.gt.f32.partialorder %v4851_v33, 0.0  ;;  %vm1740_vm12 = vcmp.gt.f32.partialorder %v4868_v30, 0.0  ;;  %v1868_v29 = vmul.f32 0.2, %v4868_v30  ;;  %v2065_v51 = vpack.c.bf16 %v1989_v5, %v1985_v36 }
 0x26d   :  { %v1870_v63 = vmul.f32 0.2, %v4872_v3  ;;  %v1991_v8 = vsel %vm1735_vm7, %v1600_v16, %v1863_v55  ;;  %v4902_v32 = vpop.f32.mrb[93].mxu1  ;;  %v4904_v12 = vpop.f32.mrb[93].mxu0  ;;  %v1869_v43 = vmul.f32 0.2, %v1417_v10  ;;  %v1610_v37 = vadd.f32 %v4786_v35, %v4306_v39 }
 0x26e   :  { %v1987_v4 = vsel %vm1731_vm2, %v4782_v23, %v1859_v60  ;;  %v1984_v41 = vsel %vm1728_vm1, %v4768_v21, %v4797_v61  ;;  %2471 = vmatprep.mubr.bf16.mxu1 %v2065_v51  ;;  %v1988_v9 = vsel %vm1732_vm4, %v4794_v34, %v1860_v38  ;;  %v1986_v35 = vsel %vm1730_vm3, %v4771_v11, %v4800_v25  ;;  %v1434_v60 = vpop.f32.mrb[94].mxu1  ;;  %v1627_v13 = vpop.f32.mrb[94].mxu0 }
 0x26f   :  { %v2067_v19 = vpack.c.bf16 %v1991_v8, %v1987_v4  ;;  %v1990_v23 = vsel %vm1734_vm6, %v4805_v15, %v1862_v42  ;;  %v2064_v62 = vpack.c.bf16 %v1988_v9, %v1984_v41  ;;  %v4927_v21 = vadd.f32 %v4814_v54, %v4298_v28  ;;  %v4933_v61 = vpop.f32.mrb[95].mxu1  ;;  %v4935_v16 = vpop.f32.mrb[95].mxu0 }
 0x270   :  { %v2066_v24 = vpack.c.bf16 %v1990_v23, %v1986_v35  ;;  %v4931_v34 = vadd.f32 %v4816_v22, %v4300_v26  ;;  %v4939_v11 = vadd.f32 %v4822_v48, %v4304_v53  ;;  %v4943_v25 = vadd.f32 %v4824_v45, %v4306_v39 }
 0x271   :  { %2632 = vmatprep.mubr.bf16.mxu0 %v2067_v19  ;;  %v4946_v15 = vadd.f32 %v1424_v50, %v4298_v28  ;;  %v4949_v54 = vadd.f32 %v1617_v0, %v4300_v26  ;;  %vm1742_vm13 = vcmp.gt.f32.partialorder %v4872_v3, 0.0  ;;  %vm1741_vm14 = vcmp.gt.f32.partialorder %v1417_v10, 0.0  ;;  %2472 = vmatmul.mubr.bf16.gmra.mrb[144].mxu1 %v2064_v62 }
 0x272   :  { %v1871_v22 = vmul.f32 0.2, %v1610_v37  ;;  %2633 = vmatmul.mubr.bf16.gmra.mrb[144].mxu0 %v2066_v24  ;;  %v1872_v47 = vmul.f32 0.2, %v4927_v21  ;;  %vm1743_vm15 = vcmp.gt.f32.partialorder %v1610_v37, 0.0  ;;  %vm1745_vm0 = vcmp.gt.f32.partialorder %v4939_v11, 0.0 }
 0x273   :  { %v4954_v48 = vmul.f32 0.2, %v4931_v34  ;;  %v1873_v45 = vmul.f32 0.2, %v4939_v11  ;;  %vm1744_vm1 = vcmp.gt.f32.partialorder %v4927_v21, 0.0  ;;  %vm1747_vm2 = vcmp.gt.f32.partialorder %v4943_v25, 0.0 }
 0x274   :  { %v1875_v56 = vmul.f32 0.2, %v4943_v25  ;;  %v1876_v46 = vmul.f32 0.2, %v4946_v15  ;;  %v1878_v58 = vmul.f32 0.2, %v4949_v54  ;;  %v1427_v40 = vadd.f32 %v4853_v14, %v4304_v53 }
 0x275   :  { %v1620_v31 = vadd.f32 %v4855_v59, %v4306_v39  ;;  %v1993_v50 = vsel %vm1737_vm9, %v4860_v57, %v1865_v6  ;;  %v1997_v0 = vsel %vm1741_vm14, %v1417_v10, %v1869_v43  ;;  %vm1746_vm3 = vcmp.gt.f32.partialorder %v4931_v34, 0.0 }
 0x276   :  { %vm1748_vm4 = vcmp.gt.f32.partialorder %v4946_v15, 0.0  ;;  %vm1750_vm5 = vcmp.gt.f32.partialorder %v4949_v54, 0.0  ;;  %v2069_v49 = vpack.c.bf16 %v1997_v0, %v1993_v50  ;;  %v1995_v17 = vsel %vm1739_vm10, %v4864_v20, %v1867_v1 }
 0x277   :  { %v1999_v14 = vsel %vm1743_vm15, %v1610_v37, %v1871_v22  ;;  %v1992_v59 = vsel %vm1736_vm8, %v4847_v18, %v4877_v7  ;;  %vm1749_vm6 = vcmp.gt.f32.partialorder %v1427_v40, 0.0  ;;  %v1877_v38 = vmul.f32 0.2, %v1427_v40 }
 0x278   :  { %vm1751_vm7 = vcmp.gt.f32.partialorder %v1620_v31, 0.0  ;;  %v1879_v27 = vmul.f32 0.2, %v1620_v31  ;;  %2479 = vmatprep.mubr.bf16.mxu1 %v2069_v49  ;;  %v2071_v57 = vpack.c.bf16 %v1999_v14, %v1995_v17  ;;  %v1996_v55 = vsel %vm1740_vm12, %v4868_v30, %v1868_v29 }
 0x279   :  { %v1994_v20 = vsel %vm1738_vm11, %v4851_v33, %v4881_v44  ;;  %v1998_v42 = vsel %vm1742_vm13, %v4872_v3, %v1870_v63  ;;  %v2068_v18 = vpack.c.bf16 %v1996_v55, %v1992_v59  ;;  %v1431_v6 = vadd.f32 %v4893_v52, %v4298_v28 }
 0x27a   :  { %v2070_v7 = vpack.c.bf16 %v1998_v42, %v1994_v20  ;;  %v1624_v1 = vadd.f32 %v4895_v2, %v4300_v26  ;;  %2640 = vmatprep.mubr.bf16.mxu0 %v2071_v57  ;;  %v1433_v30 = vadd.f32 %v4902_v32, %v4304_v53  ;;  %v1626_v10 = vadd.f32 %v4904_v12, %v4306_v39 }
 0x27b   :  { %v1435_v33 = vadd.f32 %v1434_v60, %v4298_v28  ;;  %v1628_v44 = vadd.f32 %v1627_v13, %v4300_v26  ;;  %2480 = vmatmul.mubr.bf16.gmra.mrb[148].mxu1 %v2068_v18  ;;  %vm1752_vm8 = vcmp.gt.f32.partialorder %v1431_v6, 0.0  ;;  %v1880_v3 = vmul.f32 0.2, %v1431_v6 }
 0x27c   :  { %2641 = vmatmul.mubr.bf16.gmra.mrb[148].mxu0 %v2070_v7  ;;  %vm1754_vm9 = vcmp.gt.f32.partialorder %v1624_v1, 0.0  ;;  %v1882_v36 = vmul.f32 0.2, %v1624_v1  ;;  %vm1753_vm10 = vcmp.gt.f32.partialorder %v1433_v30, 0.0  ;;  %v1881_v5 = vmul.f32 0.2, %v1433_v30 }
 0x27d   :  { %vm1755_vm11 = vcmp.gt.f32.partialorder %v1626_v10, 0.0  ;;  %v1883_v52 = vmul.f32 0.2, %v1626_v10  ;;  %vm1756_vm12 = vcmp.gt.f32.partialorder %v1435_v33, 0.0  ;;  %v1884_v2 = vmul.f32 0.2, %v1435_v33 }
 0x27e   :  { %vm1758_vm13 = vcmp.gt.f32.partialorder %v1628_v44, 0.0  ;;  %v1886_v29 = vmul.f32 0.2, %v1628_v44  ;;  %v1437_v63 = vadd.f32 %v4933_v61, %v4304_v53  ;;  %v1630_v28 = vadd.f32 %v4935_v16, %v4306_v39 }
 0x27f   :  { %v2001_v26 = vsel %vm1745_vm0, %v4939_v11, %v1873_v45  ;;  %v2005_v51 = vsel %vm1749_vm6, %v1427_v40, %v1877_v38  ;;  %v2003_v32 = vsel %vm1747_vm2, %v4943_v25, %v1875_v56  ;;  %v2007_v12 = vsel %vm1751_vm7, %v1620_v31, %v1879_v27 }
 0x280   :  { %v2073_v8 = vpack.c.bf16 %v2005_v51, %v2001_v26  ;;  %v2000_v53 = vsel %vm1744_vm1, %v4927_v21, %v1872_v47  ;;  %vm1757_vm14 = vcmp.gt.f32.partialorder %v1437_v63, 0.0  ;;  %v1885_v43 = vmul.f32 0.2, %v1437_v63  ;;  %v5036_v47 = vld [vmem:[%s5172_s6] ss:$0 sm:$0xff] }
 0x281   :  { %vm1759_vm15 = vcmp.gt.f32.partialorder %v1630_v28, 0.0  ;;  %v1887_v39 = vmul.f32 0.2, %v1630_v28  ;;  %v2075_v37 = vpack.c.bf16 %v2007_v12, %v2003_v32  ;;  %v2004_v4 = vsel %vm1748_vm4, %v4946_v15, %v1876_v46 }
 0x282   :  { %2487 = vmatprep.mubr.bf16.mxu1 %v2073_v8  ;;  %v2002_v41 = vsel %vm1746_vm3, %v4931_v34, %v4954_v48  ;;  %v2006_v19 = vsel %vm1750_vm5, %v4949_v54, %v1878_v58  ;;  %v2072_v9 = vpack.c.bf16 %v2004_v4, %v2000_v53  ;;  %v2009_v23 = vsel %vm1753_vm10, %v1433_v30, %v1881_v5 }
 0x283   :  { %v2074_v35 = vpack.c.bf16 %v2006_v19, %v2002_v41  ;;  %v2013_v60 = vsel %vm1757_vm14, %v1437_v63, %v1885_v43  ;;  %2648 = vmatprep.mubr.bf16.mxu0 %v2075_v37  ;;  %v2011_v62 = vsel %vm1755_vm11, %v1626_v10, %v1883_v52  ;;  %v2015_v24 = vsel %vm1759_vm15, %v1630_v28, %v1887_v39 }
 0x284   :  { %v2077_v13 = vpack.c.bf16 %v2013_v60, %v2009_v23  ;;  %2488 = vmatmul.mubr.bf16.gmra.mrb[152].mxu1 %v2072_v9  ;;  %v2079_v21 = vpack.c.bf16 %v2015_v24, %v2011_v62  ;;  %v2008_v61 = vsel %vm1752_vm8, %v1431_v6, %v1880_v3  ;;  %v2012_v34 = vsel %vm1756_vm12, %v1435_v33, %v1884_v2 }
 0x285   :  { %2649 = vmatmul.mubr.bf16.gmra.mrb[152].mxu0 %v2074_v35  ;;  %v2076_v16 = vpack.c.bf16 %v2012_v34, %v2008_v61  ;;  %v2010_v11 = vsel %vm1754_vm9, %v1624_v1, %v1882_v36  ;;  %v2014_v25 = vsel %vm1758_vm13, %v1628_v44, %v1886_v29 }
 0x286   :  { %2495 = vmatprep.mubr.bf16.mxu1 %v2077_v13  ;;  %2656 = vmatprep.mubr.bf16.mxu0 %v2079_v21  ;;  %v2078_v15 = vpack.c.bf16 %v2014_v25, %v2010_v11 }
 0x28c   :  { %2496 = vmatmul.mubr.bf16.gmra.mrb[156].mxu1 %v2076_v16 }
 0x28d   :  { %2657 = vmatmul.mubr.bf16.gmra.mrb[156].mxu0 %v2078_v15 }
 0x2d6   :  { %v2910_v54 = vpop.f32.mrb[96].mxu1 }
 0x2d7   :  { %v3022_v22 = vpop.f32.mrb[96].mxu0  ;;  %v2911_v48 = vpop.f32.mrb[97].mxu1 }
 0x2d8   :  { %v3023_v45 = vpop.f32.mrb[97].mxu0  ;;  %v2912_v56 = vadd.f32 %v2911_v48, %v2910_v54  ;;  %v2913_v58 = vpop.f32.mrb[98].mxu1 }
 0x2d9   :  { %v3024_v46 = vadd.f32 %v3023_v45, %v3022_v22  ;;  %v3025_v40 = vpop.f32.mrb[98].mxu0  ;;  %v2914_v31 = vpop.f32.mrb[99].mxu1 }
 0x2da   :  { %v3026_v50 = vpop.f32.mrb[99].mxu0  ;;  %v2378_v0 = vadd.f32 %v2912_v56, %v5036_v47  ;;  %v2915_v49 = vadd.f32 %v2914_v31, %v2913_v58 }
 0x2db   :  { %v3027_v17 = vadd.f32 %v3026_v50, %v3025_v40 }
 0x2dc   :  { %v2539_v14 = vadd.f32 %v3024_v46, %v2378_v0  ;;  %v2381_v59 = vadd.f32 %v2915_v49, %v5036_v47 }
 0x2de   :  { %3374 = vtanh.f32 %v2539_v14  ;;  %v2542_v38 = vadd.f32 %v3027_v17, %v2381_v59  ;;  %v2916_v27 = vpop.f32.mrb[100].mxu1 }
 0x2df   :  { %v3028_v57 = vpop.f32.mrb[100].mxu0  ;;  %v2917_v55 = vpop.f32.mrb[101].mxu1 }
 0x2e0   :  { %v3029_v20 = vpop.f32.mrb[101].mxu0  ;;  %3376 = vtanh.f32 %v2542_v38  ;;  %v2918_v42 = vadd.f32 %v2917_v55, %v2916_v27  ;;  %v2919_v7 = vpop.f32.mrb[102].mxu1 }
 0x2e1   :  { %v3030_v18 = vadd.f32 %v3029_v20, %v3028_v57  ;;  %v3031_v6 = vpop.f32.mrb[102].mxu0  ;;  %v2920_v1 = vpop.f32.mrb[103].mxu1 }
 0x2e2   :  { %v3032_v30 = vpop.f32.mrb[103].mxu0  ;;  %v2386_v10 = vadd.f32 %v2918_v42, %v5036_v47  ;;  %v2921_v33 = vadd.f32 %v2920_v1, %v2919_v7 }
 0x2e3   :  { %v3033_v44 = vadd.f32 %v3032_v30, %v3031_v6 }
 0x2e4   :  { %v2547_v3 = vadd.f32 %v3030_v18, %v2386_v10  ;;  %v2389_v36 = vadd.f32 %v2921_v33, %v5036_v47 }
 0x2e6   :  { %3378 = vtanh.f32 %v2547_v3  ;;  %v2550_v5 = vadd.f32 %v3033_v44, %v2389_v36  ;;  %v2922_v52 = vpop.f32.mrb[104].mxu1 }
 0x2e7   :  { %v2923_v29 = vpop.f32.mrb[105].mxu1 }
 0x2e8   :  { %v3375_v2 = vpop.eup %3374  ;;  %3380 = vtanh.f32 %v2550_v5  ;;  %v2924_v63 = vadd.f32 %v2923_v29, %v2922_v52  ;;  %v2925_v28 = vpop.f32.mrb[106].mxu1 }
 0x2e9   :  { %2697 = vst [vmem:[%s5173_s7] sm:$0xff] %v3375_v2  ;;  %v2926_v51 = vpop.f32.mrb[107].mxu1 }
 0x2ea   :  { %v3377_v26 = vpop.eup %3376  ;;  %v3034_v8 = vpop.f32.mrb[104].mxu0  ;;  %v2394_v32 = vadd.f32 %v2924_v63, %v5036_v47  ;;  %v2927_v12 = vadd.f32 %v2926_v51, %v2925_v28 }
 0x2eb   :  { %2698 = vst [vmem:[%s5173_s7 + $0x8] sm:$0xff] %v3377_v26  ;;  %v3035_v53 = vpop.f32.mrb[105].mxu0 }
 0x2ec   :  { %v3036_v43 = vadd.f32 %v3035_v53, %v3034_v8  ;;  %v3037_v39 = vpop.f32.mrb[106].mxu0  ;;  %v2397_v37 = vadd.f32 %v2927_v12, %v5036_v47 }
 0x2ed   :  { %v3038_v4 = vpop.f32.mrb[107].mxu0 }
 0x2ee   :  { %v2555_v41 = vadd.f32 %v3036_v43, %v2394_v32  ;;  %v3039_v19 = vadd.f32 %v3038_v4, %v3037_v39 }
 0x2f0   :  { %v3379_v9 = vpop.eup %3378  ;;  %3382 = vtanh.f32 %v2555_v41  ;;  %v2558_v35 = vadd.f32 %v3039_v19, %v2397_v37 }
 0x2f1   :  { %2699 = vst [vmem:[%s5173_s7 + $0x10] sm:$0xff] %v3379_v9 }
 0x2f2   :  { %v3381_v23 = vpop.eup %3380  ;;  %3384 = vtanh.f32 %v2558_v35  ;;  %v2928_v60 = vpop.f32.mrb[108].mxu1 }
 0x2f3   :  { %2700 = vst [vmem:[%s5173_s7 + $0x18] sm:$0xff] %v3381_v23  ;;  %v3040_v13 = vpop.f32.mrb[108].mxu0  ;;  %v2929_v62 = vpop.f32.mrb[109].mxu1 }
 0x2f4   :  { %v3041_v24 = vpop.f32.mrb[109].mxu0  ;;  %v2930_v21 = vadd.f32 %v2929_v62, %v2928_v60  ;;  %v2931_v34 = vpop.f32.mrb[110].mxu1 }
 0x2f5   :  { %v3042_v61 = vadd.f32 %v3041_v24, %v3040_v13  ;;  %v3043_v16 = vpop.f32.mrb[110].mxu0  ;;  %v2932_v11 = vpop.f32.mrb[111].mxu1 }
 0x2f6   :  { %v3044_v25 = vpop.f32.mrb[111].mxu0  ;;  %v2402_v15 = vadd.f32 %v2930_v21, %v5036_v47  ;;  %v2933_v54 = vadd.f32 %v2932_v11, %v2931_v34 }
 0x2f7   :  { %v3045_v22 = vadd.f32 %v3044_v25, %v3043_v16 }
 0x2f8   :  { %v2563_v48 = vadd.f32 %v3042_v61, %v2402_v15  ;;  %v2405_v45 = vadd.f32 %v2933_v54, %v5036_v47 }
 0x2fa   :  { %v3383_v56 = vpop.eup %3382  ;;  %3386 = vtanh.f32 %v2563_v48  ;;  %v2566_v46 = vadd.f32 %v3045_v22, %v2405_v45 }
 0x2fb   :  { %2701 = vst [vmem:[%s5173_s7 + $0x20] sm:$0xff] %v3383_v56  ;;  %v2934_v58 = vpop.f32.mrb[112].mxu1  ;;  %v3046_v40 = vpop.f32.mrb[112].mxu0 }
 0x2fc   :  { %v3385_v31 = vpop.eup %3384  ;;  %3388 = vtanh.f32 %v2566_v46  ;;  %v2935_v50 = vpop.f32.mrb[113].mxu1 }
 0x2fd   :  { %v3047_v0 = vpop.f32.mrb[113].mxu0  ;;  %2702 = vst [vmem:[%s5173_s7 + $0x28] sm:$0xff] %v3385_v31  ;;  %v2936_v49 = vadd.f32 %v2935_v50, %v2934_v58  ;;  %v2937_v14 = vpop.f32.mrb[114].mxu1 }
 0x2fe   :  { %v3048_v17 = vadd.f32 %v3047_v0, %v3046_v40  ;;  %v3049_v59 = vpop.f32.mrb[114].mxu0  ;;  %v2938_v38 = vpop.f32.mrb[115].mxu1 }
 0x2ff   :  { %v3050_v27 = vpop.f32.mrb[115].mxu0  ;;  %v2410_v57 = vadd.f32 %v2936_v49, %v5036_v47  ;;  %v2939_v55 = vadd.f32 %v2938_v38, %v2937_v14 }
 0x300   :  { %v3051_v20 = vadd.f32 %v3050_v27, %v3049_v59 }
 0x301   :  { %v2571_v42 = vadd.f32 %v3048_v17, %v2410_v57  ;;  %v2413_v18 = vadd.f32 %v2939_v55, %v5036_v47 }
 0x303   :  { %3390 = vtanh.f32 %v2571_v42  ;;  %v2574_v7 = vadd.f32 %v3051_v20, %v2413_v18 }
 0x304   :  { %v3387_v6 = vpop.eup %3386  ;;  %v2940_v1 = vpop.f32.mrb[116].mxu1 }
 0x305   :  { %v3052_v30 = vpop.f32.mrb[116].mxu0  ;;  %2703 = vst [vmem:[%s5173_s7 + $0x30] sm:$0xff] %v3387_v6  ;;  %3392 = vtanh.f32 %v2574_v7  ;;  %v2941_v10 = vpop.f32.mrb[117].mxu1 }
 0x306   :  { %v3053_v33 = vpop.f32.mrb[117].mxu0  ;;  %v3389_v44 = vpop.eup %3388  ;;  %v2942_v3 = vadd.f32 %v2941_v10, %v2940_v1 }
 0x307   :  { %v3054_v36 = vadd.f32 %v3053_v33, %v3052_v30  ;;  %v2943_v5 = vpop.f32.mrb[118].mxu1  ;;  %v3055_v52 = vpop.f32.mrb[118].mxu0  ;;  %2704 = vst [vmem:[%s5173_s7 + $0x38] sm:$0xff] %v3389_v44 }
 0x308   :  { %v2944_v2 = vpop.f32.mrb[119].mxu1  ;;  %v3056_v29 = vpop.f32.mrb[119].mxu0  ;;  %v2418_v63 = vadd.f32 %v2942_v3, %v5036_v47 }
 0x309   :  { %v2945_v28 = vadd.f32 %v2944_v2, %v2943_v5  ;;  %v3057_v26 = vadd.f32 %v3056_v29, %v3055_v52 }
 0x30a   :  { %v2579_v51 = vadd.f32 %v3054_v36, %v2418_v63 }
 0x30b   :  { %v2421_v8 = vadd.f32 %v2945_v28, %v5036_v47 }
 0x30c   :  { %3394 = vtanh.f32 %v2579_v51 }
 0x30d   :  { %v2582_v32 = vadd.f32 %v3057_v26, %v2421_v8  ;;  %v3391_v12 = vpop.eup %3390  ;;  %v2946_v53 = vpop.f32.mrb[120].mxu1 }
 0x30e   :  { %v3058_v43 = vpop.f32.mrb[120].mxu0  ;;  %2705 = vst [vmem:[%s5173_s7 + $0x40] sm:$0xff] %v3391_v12  ;;  %v2947_v39 = vpop.f32.mrb[121].mxu1 }
 0x30f   :  { %3396 = vtanh.f32 %v2582_v32  ;;  %v3059_v37 = vpop.f32.mrb[121].mxu0  ;;  %v3393_v4 = vpop.eup %3392  ;;  %v2948_v41 = vadd.f32 %v2947_v39, %v2946_v53 }
 0x310   :  { %v3060_v19 = vadd.f32 %v3059_v37, %v3058_v43  ;;  %v2949_v9 = vpop.f32.mrb[122].mxu1  ;;  %v3061_v35 = vpop.f32.mrb[122].mxu0  ;;  %2706 = vst [vmem:[%s5173_s7 + $0x48] sm:$0xff] %v3393_v4 }
 0x311   :  { %v2950_v23 = vpop.f32.mrb[123].mxu1  ;;  %v3062_v60 = vpop.f32.mrb[123].mxu0  ;;  %v2426_v13 = vadd.f32 %v2948_v41, %v5036_v47 }
 0x312   :  { %v2951_v62 = vadd.f32 %v2950_v23, %v2949_v9  ;;  %v3063_v24 = vadd.f32 %v3062_v60, %v3061_v35 }
 0x313   :  { %v2587_v21 = vadd.f32 %v3060_v19, %v2426_v13 }
 0x314   :  { %v2429_v61 = vadd.f32 %v2951_v62, %v5036_v47 }
 0x315   :  { %3398 = vtanh.f32 %v2587_v21 }
 0x316   :  { %v2590_v34 = vadd.f32 %v3063_v24, %v2429_v61  ;;  %v3395_v16 = vpop.eup %3394  ;;  %v2952_v11 = vpop.f32.mrb[124].mxu1 }
 0x317   :  { %v3064_v25 = vpop.f32.mrb[124].mxu0  ;;  %2707 = vst [vmem:[%s5173_s7 + $0x50] sm:$0xff] %v3395_v16  ;;  %v2953_v15 = vpop.f32.mrb[125].mxu1 }
 0x318   :  { %3400 = vtanh.f32 %v2590_v34  ;;  %v3065_v54 = vpop.f32.mrb[125].mxu0  ;;  %v2954_v48 = vadd.f32 %v2953_v15, %v2952_v11  ;;  %v2955_v56 = vpop.f32.mrb[126].mxu1 }
 0x319   :  { %v3397_v22 = vpop.eup %3396  ;;  %v3066_v45 = vadd.f32 %v3065_v54, %v3064_v25  ;;  %v3067_v46 = vpop.f32.mrb[126].mxu0 }
 0x31a   :  { %2708 = vst [vmem:[%s5173_s7 + $0x58] sm:$0xff] %v3397_v22  ;;  %v2956_v58 = vpop.f32.mrb[127].mxu1  ;;  %v3068_v40 = vpop.f32.mrb[127].mxu0  ;;  %v2434_v31 = vadd.f32 %v2954_v48, %v5036_v47 }
 0x31b   :  { %v2957_v50 = vadd.f32 %v2956_v58, %v2955_v56  ;;  %v3069_v0 = vadd.f32 %v3068_v40, %v3067_v46 }
 0x31c   :  { %v2595_v49 = vadd.f32 %v3066_v45, %v2434_v31 }
 0x31d   :  { %v2437_v17 = vadd.f32 %v2957_v50, %v5036_v47 }
 0x31e   :  { %3402 = vtanh.f32 %v2595_v49 }
 0x31f   :  { %v2598_v14 = vadd.f32 %v3069_v0, %v2437_v17  ;;  %v3399_v59 = vpop.eup %3398  ;;  %v2958_v38 = vpop.f32.mrb[128].mxu1 }
 0x320   :  { %v3070_v27 = vpop.f32.mrb[128].mxu0  ;;  %2709 = vst [vmem:[%s5173_s7 + $0x60] sm:$0xff] %v3399_v59  ;;  %v2959_v57 = vpop.f32.mrb[129].mxu1 }
 0x321   :  { %3404 = vtanh.f32 %v2598_v14  ;;  %v3071_v55 = vpop.f32.mrb[129].mxu0  ;;  %v2960_v42 = vadd.f32 %v2959_v57, %v2958_v38  ;;  %v2961_v7 = vpop.f32.mrb[130].mxu1 }
 0x322   :  { %v3401_v20 = vpop.eup %3400  ;;  %v3072_v18 = vadd.f32 %v3071_v55, %v3070_v27  ;;  %v3073_v6 = vpop.f32.mrb[130].mxu0 }
 0x323   :  { %2710 = vst [vmem:[%s5173_s7 + $0x68] sm:$0xff] %v3401_v20  ;;  %v2962_v1 = vpop.f32.mrb[131].mxu1  ;;  %v3074_v30 = vpop.f32.mrb[131].mxu0  ;;  %v2442_v10 = vadd.f32 %v2960_v42, %v5036_v47 }
 0x324   :  { %v2963_v33 = vadd.f32 %v2962_v1, %v2961_v7  ;;  %v3075_v44 = vadd.f32 %v3074_v30, %v3073_v6 }
 0x325   :  { %v2603_v3 = vadd.f32 %v3072_v18, %v2442_v10 }
 0x326   :  { %v2445_v36 = vadd.f32 %v2963_v33, %v5036_v47 }
 0x327   :  { %3406 = vtanh.f32 %v2603_v3 }
 0x328   :  { %v2606_v5 = vadd.f32 %v3075_v44, %v2445_v36  ;;  %v3403_v52 = vpop.eup %3402  ;;  %v2964_v2 = vpop.f32.mrb[132].mxu1 }
 0x329   :  { %v3076_v29 = vpop.f32.mrb[132].mxu0  ;;  %2711 = vst [vmem:[%s5173_s7 + $0x70] sm:$0xff] %v3403_v52  ;;  %v2965_v63 = vpop.f32.mrb[133].mxu1 }
 0x32a   :  { %3408 = vtanh.f32 %v2606_v5  ;;  %v3077_v28 = vpop.f32.mrb[133].mxu0  ;;  %v2966_v51 = vadd.f32 %v2965_v63, %v2964_v2  ;;  %v2967_v32 = vpop.f32.mrb[134].mxu1 }
 0x32b   :  { %v3405_v26 = vpop.eup %3404  ;;  %v3078_v8 = vadd.f32 %v3077_v28, %v3076_v29  ;;  %v3079_v12 = vpop.f32.mrb[134].mxu0 }
 0x32c   :  { %2712 = vst [vmem:[%s5173_s7 + $0x78] sm:$0xff] %v3405_v26  ;;  %v2968_v53 = vpop.f32.mrb[135].mxu1  ;;  %v3080_v43 = vpop.f32.mrb[135].mxu0  ;;  %v2450_v39 = vadd.f32 %v2966_v51, %v5036_v47 }
 0x32d   :  { %v2969_v37 = vadd.f32 %v2968_v53, %v2967_v32  ;;  %v3081_v4 = vadd.f32 %v3080_v43, %v3079_v12 }
 0x32e   :  { %v2611_v41 = vadd.f32 %v3078_v8, %v2450_v39 }
 0x32f   :  { %v2453_v19 = vadd.f32 %v2969_v37, %v5036_v47 }
 0x330   :  { %3410 = vtanh.f32 %v2611_v41 }
 0x331   :  { %v2614_v9 = vadd.f32 %v3081_v4, %v2453_v19  ;;  %v3407_v35 = vpop.eup %3406  ;;  %v2970_v23 = vpop.f32.mrb[136].mxu1 }
 0x332   :  { %v3082_v60 = vpop.f32.mrb[136].mxu0  ;;  %2713 = vst [vmem:[%s5173_s7 + $0x80] sm:$0xff] %v3407_v35  ;;  %v2971_v13 = vpop.f32.mrb[137].mxu1 }
 0x333   :  { %3412 = vtanh.f32 %v2614_v9  ;;  %v3083_v62 = vpop.f32.mrb[137].mxu0  ;;  %v2972_v21 = vadd.f32 %v2971_v13, %v2970_v23  ;;  %v2973_v34 = vpop.f32.mrb[138].mxu1 }
 0x334   :  { %v3409_v24 = vpop.eup %3408  ;;  %v3084_v61 = vadd.f32 %v3083_v62, %v3082_v60  ;;  %v3085_v16 = vpop.f32.mrb[138].mxu0 }
 0x335   :  { %2714 = vst [vmem:[%s5173_s7 + $0x88] sm:$0xff] %v3409_v24  ;;  %v2974_v11 = vpop.f32.mrb[139].mxu1  ;;  %v3086_v25 = vpop.f32.mrb[139].mxu0  ;;  %v2458_v15 = vadd.f32 %v2972_v21, %v5036_v47 }
 0x336   :  { %v2975_v54 = vadd.f32 %v2974_v11, %v2973_v34  ;;  %v3087_v22 = vadd.f32 %v3086_v25, %v3085_v16 }
 0x337   :  { %v2619_v48 = vadd.f32 %v3084_v61, %v2458_v15 }
 0x338   :  { %v2461_v45 = vadd.f32 %v2975_v54, %v5036_v47 }
 0x339   :  { %3414 = vtanh.f32 %v2619_v48 }
 0x33a   :  { %v2622_v56 = vadd.f32 %v3087_v22, %v2461_v45  ;;  %v3411_v46 = vpop.eup %3410  ;;  %v2976_v58 = vpop.f32.mrb[140].mxu1 }
 0x33b   :  { %v3088_v40 = vpop.f32.mrb[140].mxu0  ;;  %2715 = vst [vmem:[%s5173_s7 + $0x90] sm:$0xff] %v3411_v46  ;;  %v2977_v31 = vpop.f32.mrb[141].mxu1 }
 0x33c   :  { %3416 = vtanh.f32 %v2622_v56  ;;  %v3089_v50 = vpop.f32.mrb[141].mxu0  ;;  %v2978_v49 = vadd.f32 %v2977_v31, %v2976_v58  ;;  %v2979_v14 = vpop.f32.mrb[142].mxu1 }
 0x33d   :  { %v3413_v0 = vpop.eup %3412  ;;  %v3090_v17 = vadd.f32 %v3089_v50, %v3088_v40  ;;  %v3091_v59 = vpop.f32.mrb[142].mxu0 }
 0x33e   :  { %2716 = vst [vmem:[%s5173_s7 + $0x98] sm:$0xff] %v3413_v0  ;;  %v2980_v38 = vpop.f32.mrb[143].mxu1  ;;  %v3092_v27 = vpop.f32.mrb[143].mxu0  ;;  %v2466_v57 = vadd.f32 %v2978_v49, %v5036_v47 }
 0x33f   :  { %v2981_v55 = vadd.f32 %v2980_v38, %v2979_v14  ;;  %v3093_v20 = vadd.f32 %v3092_v27, %v3091_v59 }
 0x340   :  { %v2627_v42 = vadd.f32 %v3090_v17, %v2466_v57 }
 0x341   :  { %v2469_v18 = vadd.f32 %v2981_v55, %v5036_v47 }
 0x342   :  { %3418 = vtanh.f32 %v2627_v42 }
 0x343   :  { %v2630_v7 = vadd.f32 %v3093_v20, %v2469_v18  ;;  %v3415_v6 = vpop.eup %3414 }
 0x344   :  { %v2982_v1 = vpop.f32.mrb[144].mxu1  ;;  %2717 = vst [vmem:[%s5173_s7 + $0xa0] sm:$0xff] %v3415_v6 }
 0x345   :  { %v3094_v30 = vpop.f32.mrb[144].mxu0  ;;  %3420 = vtanh.f32 %v2630_v7  ;;  %v2983_v10 = vpop.f32.mrb[145].mxu1 }
 0x346   :  { %v3095_v33 = vpop.f32.mrb[145].mxu0  ;;  %v3417_v44 = vpop.eup %3416  ;;  %v2984_v3 = vadd.f32 %v2983_v10, %v2982_v1 }
 0x347   :  { %v3096_v36 = vadd.f32 %v3095_v33, %v3094_v30  ;;  %v2985_v5 = vpop.f32.mrb[146].mxu1  ;;  %v3097_v52 = vpop.f32.mrb[146].mxu0  ;;  %2718 = vst [vmem:[%s5173_s7 + $0xa8] sm:$0xff] %v3417_v44 }
 0x348   :  { %v2986_v2 = vpop.f32.mrb[147].mxu1  ;;  %v3098_v29 = vpop.f32.mrb[147].mxu0  ;;  %v2474_v63 = vadd.f32 %v2984_v3, %v5036_v47 }
 0x349   :  { %v2987_v28 = vadd.f32 %v2986_v2, %v2985_v5  ;;  %v3099_v26 = vadd.f32 %v3098_v29, %v3097_v52 }
 0x34a   :  { %v2635_v51 = vadd.f32 %v3096_v36, %v2474_v63 }
 0x34b   :  { %v2477_v8 = vadd.f32 %v2987_v28, %v5036_v47 }
 0x34c   :  { %3422 = vtanh.f32 %v2635_v51  ;;  %v3419_v12 = vpop.eup %3418 }
 0x34d   :  { %v2638_v32 = vadd.f32 %v3099_v26, %v2477_v8  ;;  %2719 = vst [vmem:[%s5173_s7 + $0xb0] sm:$0xff] %v3419_v12 }
 0x34e   :  { %v2988_v53 = vpop.f32.mrb[148].mxu1 }
 0x34f   :  { %v3100_v43 = vpop.f32.mrb[148].mxu0  ;;  %3424 = vtanh.f32 %v2638_v32  ;;  %v2989_v39 = vpop.f32.mrb[149].mxu1 }
 0x350   :  { %v3101_v37 = vpop.f32.mrb[149].mxu0  ;;  %v3421_v4 = vpop.eup %3420  ;;  %v2990_v41 = vadd.f32 %v2989_v39, %v2988_v53 }
 0x351   :  { %v3102_v19 = vadd.f32 %v3101_v37, %v3100_v43  ;;  %v2991_v9 = vpop.f32.mrb[150].mxu1  ;;  %v3103_v35 = vpop.f32.mrb[150].mxu0  ;;  %2720 = vst [vmem:[%s5173_s7 + $0xb8] sm:$0xff] %v3421_v4 }
 0x352   :  { %v2992_v23 = vpop.f32.mrb[151].mxu1  ;;  %v3104_v60 = vpop.f32.mrb[151].mxu0  ;;  %v2482_v13 = vadd.f32 %v2990_v41, %v5036_v47 }
 0x353   :  { %v2993_v62 = vadd.f32 %v2992_v23, %v2991_v9  ;;  %v3105_v24 = vadd.f32 %v3104_v60, %v3103_v35 }
 0x354   :  { %v2643_v21 = vadd.f32 %v3102_v19, %v2482_v13 }
 0x355   :  { %v2485_v61 = vadd.f32 %v2993_v62, %v5036_v47 }
 0x356   :  { %3426 = vtanh.f32 %v2643_v21  ;;  %v3423_v16 = vpop.eup %3422 }
 0x357   :  { %v2646_v34 = vadd.f32 %v3105_v24, %v2485_v61  ;;  %v2994_v11 = vpop.f32.mrb[152].mxu1  ;;  %2721 = vst [vmem:[%s5173_s7 + $0xc0] sm:$0xff] %v3423_v16 }
 0x358   :  { %v3106_v25 = vpop.f32.mrb[152].mxu0  ;;  %v2995_v15 = vpop.f32.mrb[153].mxu1 }
 0x359   :  { %3428 = vtanh.f32 %v2646_v34  ;;  %v3107_v54 = vpop.f32.mrb[153].mxu0  ;;  %v3425_v22 = vpop.eup %3424  ;;  %v2996_v48 = vadd.f32 %v2995_v15, %v2994_v11 }
 0x35a   :  { %v3108_v45 = vadd.f32 %v3107_v54, %v3106_v25  ;;  %v2997_v56 = vpop.f32.mrb[154].mxu1  ;;  %v3109_v46 = vpop.f32.mrb[154].mxu0  ;;  %2722 = vst [vmem:[%s5173_s7 + $0xc8] sm:$0xff] %v3425_v22 }
 0x35b   :  { %v2998_v58 = vpop.f32.mrb[155].mxu1  ;;  %v3110_v40 = vpop.f32.mrb[155].mxu0  ;;  %v2490_v31 = vadd.f32 %v2996_v48, %v5036_v47 }
 0x35c   :  { %v2999_v50 = vadd.f32 %v2998_v58, %v2997_v56  ;;  %v3111_v0 = vadd.f32 %v3110_v40, %v3109_v46 }
 0x35d   :  { %v2651_v49 = vadd.f32 %v3108_v45, %v2490_v31 }
 0x35e   :  { %v2493_v17 = vadd.f32 %v2999_v50, %v5036_v47 }
 0x35f   :  { %3430 = vtanh.f32 %v2651_v49  ;;  %v3000_v59 = vpop.f32.mrb[156].mxu1 }
 0x360   :  { %v2654_v14 = vadd.f32 %v3111_v0, %v2493_v17  ;;  %v3112_v38 = vpop.f32.mrb[156].mxu0  ;;  %v3427_v27 = vpop.eup %3426 }
 0x361   :  { %v3001_v57 = vpop.f32.mrb[157].mxu1  ;;  %v3113_v55 = vpop.f32.mrb[157].mxu0  ;;  %2723 = vst [vmem:[%s5173_s7 + $0xd0] sm:$0xff] %v3427_v27 }
 0x362   :  { %3432 = vtanh.f32 %v2654_v14  ;;  %v3002_v20 = vadd.f32 %v3001_v57, %v3000_v59  ;;  %v3114_v42 = vadd.f32 %v3113_v55, %v3112_v38  ;;  %v3003_v18 = vpop.f32.mrb[158].mxu1  ;;  %v3115_v7 = vpop.f32.mrb[158].mxu0 }
 0x363   :  { %v3429_v6 = vpop.eup %3428  ;;  %v3004_v1 = vpop.f32.mrb[159].mxu1 }
 0x364   :  { %v3116_v30 = vpop.f32.mrb[159].mxu0  ;;  %2724 = vst [vmem:[%s5173_s7 + $0xd8] sm:$0xff] %v3429_v6  ;;  %v2498_v10 = vadd.f32 %v3002_v20, %v5036_v47  ;;  %v3005_v33 = vadd.f32 %v3004_v1, %v3003_v18 }
 0x365   :  { %v3117_v44 = vadd.f32 %v3116_v30, %v3115_v7 }
 0x366   :  { %v2659_v3 = vadd.f32 %v3114_v42, %v2498_v10  ;;  %v2501_v36 = vadd.f32 %v3005_v33, %v5036_v47 }
 0x368   :  { %3434 = vtanh.f32 %v2659_v3  ;;  %v2662_v5 = vadd.f32 %v3117_v44, %v2501_v36 }
 0x369   :  { %v3431_v52 = vpop.eup %3430 }
 0x36a   :  { %3436 = vtanh.f32 %v2662_v5  ;;  %2725 = vst [vmem:[%s5173_s7 + $0xe0] sm:$0xff] %v3431_v52 }
 0x36c   :  { %v3433_v2 = vpop.eup %3432 }
 0x36d   :  { %2726 = vst [vmem:[%s5173_s7 + $0xe8] sm:$0xff] %v3433_v2 }
 0x372   :  { %v3435_v29 = vpop.eup %3434 }
 0x373   :  { %2727 = vst [vmem:[%s5173_s7 + $0xf0] sm:$0xff] %v3435_v29 }
 0x374   :  { %v3437_v63 = vpop.eup %3436 }
 0x375   :  { %2728 = vst [vmem:[%s5173_s7 + $0xf8] sm:$0xff] %v3437_v63 }

</bundles_post_ra>
